<compile_context>
chip_gen: v5e
topology: v5e:2x2
jax: 0.10.0
libtpu: 0.0.40
codegen_flags: <defaults>
</compile_context>

<pallas_src>
import numpy as np

import jax
import jax.numpy as jnp
from jax import lax
from jax.experimental import pallas as pl
from jax.experimental.pallas import tpu as pltpu

KH = KW = 3
CIN = 3
COUT = 16
TAPS = CIN * KH * KW      # 27
TASK_IN = 2560
TASK_OUT = 7


def _adaptive_pool_matrix(in_size, out_size):
    """(out_size, in_size) averaging matrix, torch AdaptiveAvgPool bin rules."""
    m = np.zeros((out_size, in_size), np.float32)
    for i in range(out_size):
        lo = (i * in_size) // out_size
        hi = -(-((i + 1) * in_size) // out_size)   # ceil
        m[i, lo:hi] = 1.0 / float(hi - lo)
    return m


# ---------------------------------------------------------------------------
# Kernel 1: Conv2d(3->16, 3x3, valid) + bias + ReLU + adaptive avg pool.
# Grid = (batch, channel_group); the full image block is shared across the
# channel-group axis (same block index -> fetched once per image).
# ---------------------------------------------------------------------------
def _make_vision_kernel(H, W, ph, pw, cg, sr):
    ho, wo = H - KH + 1, W - KW + 1
    ns = -(-ho // sr)   # number of row strips; last strip is clamped

    def kernel(x_ref, w_ref, b_ref, pc_ref, pbd_ref, o_ref, y_ref):
        # x_ref  : (1, CIN, H, W)     f32  VMEM  full image (shared across groups)
        # w_ref  : (COUT*TAPS,)       f32  SMEM  conv weights, OIHW flattened 1-D
        # b_ref  : (COUT,)            f32  SMEM  conv bias
        # pc_ref : (wo, pw)           bf16 VMEM  column-pool matrix
        # pbd_ref: (cg*ph, cg*ho)     bf16 VMEM  block-diagonal row-pool matrix
        # o_ref  : (1, cg*ph, pw)     f32  VMEM  pooled output block
        # y_ref  : (cg*ho, wo)        f32  VMEM  scratch: post-ReLU planes (channel-stacked)
        g = pl.program_id(1)
        wbase = g * (cg * TAPS)
        bbase = g * cg

        def strip_body(s, carry):
            # Clamp the last strip so every output row in [0, ho) is produced
            # without reading past input row H-1 (overlap rows recompute
            # identical values).
            row0 = jnp.minimum(s * sr, ho - sr)
            accs = [jnp.zeros((sr, wo), jnp.float32) for _ in range(cg)]
            for cin in range(CIN):
                for kh in range(KH):
                    # One aligned full-width row-block load per (cin, kh).
                    rows = x_ref[0, cin, pl.ds(row0 + kh, sr), :]       # (sr, W)
                    for kw in range(KW):
                        # kw lane shift hoisted out of the channel loop; at
                        # strip granularity this stays in vregs (XLU shift),
                        # no plane-sized shifted copies in VMEM.
                        patch = rows[:, kw:kw + wo]                      # (sr, wo)
                        toff = (cin * KH + kh) * KW + kw
                        for co in range(cg):
                            w_sc = w_ref[wbase + co * TAPS + toff]       # SMEM scalar
                            accs[co] = accs[co] + patch * w_sc
            for co in range(cg):
                y = jnp.maximum(accs[co] + b_ref[bbase + co], 0.0)       # bias + ReLU
                y_ref[pl.ds(co * ho + row0, sr), :] = y
            return carry

        lax.fori_loop(0, ns, strip_body, 0)

        # Batched adaptive average pooling on the MXU (bf16 operands, f32 acc):
        #   column pool: (cg*ho, wo) @ (wo, pw)                 -> (cg*ho, pw)
        #   row pool   : block-diag (cg*ph, cg*ho) @ (cg*ho,pw) -> (cg*ph, pw)
        yb = y_ref[...].astype(jnp.bfloat16)
        t = jnp.dot(yb, pc_ref[...], preferred_element_type=jnp.float32)
        pooled = jnp.dot(pbd_ref[...], t.astype(jnp.bfloat16),
                         preferred_element_type=jnp.float32)
        o_ref[0] = pooled

    return kernel


def vision_adapter(x_nchw, conv_w, conv_b, pool_out, *,
                   channel_group=4, strip_rows=8):
    """x_nchw: (B, 3, H, W); conv_w: (16, 3, 3, 3) torch OIHW; conv_b: (16,)."""
    B, cin, H, W = x_nchw.shape
    assert cin == CIN
    assert conv_w.shape == (COUT, CIN, KH, KW)
    ho, wo = H - KH + 1, W - KW + 1
    assert ho >= 1 and wo >= 1
    ph, pw = pool_out

    cg = channel_group if COUT % channel_group == 0 else COUT
    ncg = COUT // cg
    # (8,128) rule for the output block's second-minor dim: fall back to a
    # single channel group (full dim) if cg*ph is not sublane-aligned.
    if (cg * ph) % 8 != 0 and ncg > 1:
        cg, ncg = COUT, 1
    sr = min(strip_rows, ho)

    w_flat = conv_w.reshape(COUT * TAPS).astype(jnp.float32)          # 1-D SMEM
    bias = conv_b.astype(jnp.float32)
    pc = jnp.asarray(_adaptive_pool_matrix(wo, pw).T, jnp.bfloat16)   # (wo, pw)
    pr = _adaptive_pool_matrix(ho, ph)                                # (ph, ho)
    pbd = jnp.asarray(np.kron(np.eye(cg, dtype=np.float32), pr),
                      jnp.bfloat16)                                   # (cg*ph, cg*ho)

    kernel = _make_vision_kernel(H, W, ph, pw, cg, sr)
    out = pl.pallas_call(
        kernel,
        out_shape=jax.ShapeDtypeStruct((B, COUT * ph, pw), jnp.float32),
        grid=(B, ncg),
        in_specs=[
            pl.BlockSpec((1, CIN, H, W), lambda b, g: (b, 0, 0, 0)),
            pl.BlockSpec(memory_space=pltpu.MemorySpace.SMEM),   # conv weights
            pl.BlockSpec(memory_space=pltpu.MemorySpace.SMEM),   # conv bias
            pl.BlockSpec((wo, pw), lambda b, g: (0, 0)),
            pl.BlockSpec((cg * ph, cg * ho), lambda b, g: (0, 0)),
        ],
        out_specs=pl.BlockSpec((1, cg * ph, pw), lambda b, g: (b, g, 0)),
        scratch_shapes=[pltpu.VMEM((cg * ho, wo), jnp.float32)],
        compiler_params=pltpu.CompilerParams(
            dimension_semantics=("parallel", "parallel"),   # v7x: 2 TCs busy at B=1
            vmem_limit_bytes=32 * 1024 * 1024,
        ),
    )(x_nchw.astype(jnp.float32), w_flat, bias, pc, pbd)
    return out.reshape(B, COUT, ph, pw)


# ---------------------------------------------------------------------------
# Kernel 2: task_head = Linear(2560, 7).  Weight is pre-transposed once in the
# wrapper to (K, N) so the kernel contracts K with no in-kernel transpose.
# ---------------------------------------------------------------------------
def task_head_kernel(x_ref, w_ref, b_ref, o_ref):
    # x_ref: (B, K)  w_ref: (K, N)  b_ref: (1, N)  o_ref: (B, N)
    o_ref[...] = jnp.dot(x_ref[...], w_ref[...],
                         preferred_element_type=jnp.float32) + b_ref[...]


def task_head(feat, lin_w, lin_b):
    """feat: (B, 2560); lin_w: (7, 2560) torch layout; lin_b: (7,)."""
    B, K = feat.shape
    N = lin_w.shape[0]
    assert lin_w.shape == (N, K)
    w_t = lin_w.T.astype(jnp.float32)                 # one-time tiny transpose
    b2 = lin_b.reshape(1, N).astype(jnp.float32)
    return pl.pallas_call(
        task_head_kernel,
        out_shape=jax.ShapeDtypeStruct((B, N), jnp.float32),
        grid=(1,),
        in_specs=[
            pl.BlockSpec((B, K), lambda i: (0, 0)),
            pl.BlockSpec((K, N), lambda i: (0, 0)),
            pl.BlockSpec((1, N), lambda i: (0, 0)),
        ],
        out_specs=pl.BlockSpec((B, N), lambda i: (0, 0)),
        compiler_params=pltpu.CompilerParams(vmem_limit_bytes=32 * 1024 * 1024),
    )(feat.astype(jnp.float32), w_t, b2)


# ---------------------------------------------------------------------------
# Pure-JAX references (validation only).
# ---------------------------------------------------------------------------
def _adaptive_avg_pool_ref(y, out_hw):
    _, _, H, W = y.shape
    ph, pw = out_hw
    rows = []
    for i in range(ph):
        hs = (i * H) // ph
        he = -(-((i + 1) * H) // ph)
        cols = []
        for j in range(pw):
            ws = (j * W) // pw
            we = -(-((j + 1) * W) // pw)
            cols.append(y[:, :, hs:he, ws:we].mean(axis=(2, 3)))
        rows.append(jnp.stack(cols, axis=-1))
    return jnp.stack(rows, axis=-2)  # (B, C, ph, pw)


def vision_adapter_ref(x_nchw, conv_w, conv_b, pool_out):
    y = lax.conv_general_dilated(
        x_nchw.astype(jnp.float32), conv_w.astype(jnp.float32),
        window_strides=(1, 1), padding="VALID",
        dimension_numbers=("NCHW", "OIHW", "NCHW"),
        precision=lax.Precision.HIGHEST,
    ) + conv_b.reshape(1, COUT, 1, 1)
    y = jnp.maximum(y, 0.0)
    return _adaptive_avg_pool_ref(y, pool_out)


def task_head_ref(feat, lin_w, lin_b):
    return jnp.dot(feat.astype(jnp.float32), lin_w.T.astype(jnp.float32),
                   precision=lax.Precision.HIGHEST) + lin_b


if __name__ == "__main__":
    key = jax.random.PRNGKey(0)
    ks = jax.random.split(key, 7)

    B = 2
    # Case A: divisible pooling (18x18 -> conv 16x16 -> adaptive pool 4x4).
    xA = jax.random.normal(ks[0], (B, CIN, 18, 18), jnp.float32)
    # Case B: pool output larger than conv output — the module's real shape
    # pattern (224 -> 222 -> pool back to 224), here 9 -> 7 -> 8.
    xB = jax.random.normal(ks[1], (B, CIN, 9, 9), jnp.float32)

    conv_w = jax.random.normal(ks[2], (COUT, CIN, KH, KW), jnp.float32) * 0.1
    conv_b = jax.random.normal(ks[3], (COUT,), jnp.float32) * 0.1
    lin_w = jax.random.normal(ks[4], (TASK_OUT, TASK_IN), jnp.float32) * 0.02
    lin_b = jax.random.normal(ks[5], (TASK_OUT,), jnp.float32) * 0.02
    feat = jax.random.normal(ks[6], (B, TASK_IN), jnp.float32)

    outA = jax.block_until_ready(vision_adapter(xA, conv_w, conv_b, (4, 4)))
    outB = jax.block_until_ready(vision_adapter(xB, conv_w, conv_b, (8, 8)))
    th = jax.block_until_ready(task_head(feat, lin_w, lin_b))

    refA = vision_adapter_ref(xA, conv_w, conv_b, (4, 4))
    refB = vision_adapter_ref(xB, conv_w, conv_b, (8, 8))
    refT = task_head_ref(feat, lin_w, lin_b)

    assert outA.shape == (B, COUT, 4, 4)
    assert outB.shape == (B, COUT, 8, 8)
    assert th.shape == (B, TASK_OUT)
    # Conv is exact f32; pooling matmuls use bf16 operands (native MXU rate),
    # hence the 3e-2 tolerance for the vision adapter.
    assert jnp.allclose(outA, refA, atol=3e-2, rtol=3e-2)
    assert jnp.allclose(outB, refB, atol=3e-2, rtol=3e-2)
    assert jnp.allclose(th, refT, atol=1e-2, rtol=1e-2)

    print("KERNEL_OK")
</pallas_src>

<mosaic_0001>
module attributes {stable_mosaic.version = 11 : i64} {
  func.func @kernel(%arg0: i32, %arg1: i32, %arg2: memref<1x3x18x18xf32, #tpu.memory_space<vmem>>, %arg3: memref<432xf32, #tpu.memory_space<smem>>, %arg4: memref<16xf32, #tpu.memory_space<smem>>, %arg5: memref<16x4xbf16, #tpu.memory_space<vmem>>, %arg6: memref<16x64xbf16, #tpu.memory_space<vmem>>, %arg7: memref<1x16x4xf32, #tpu.memory_space<vmem>>, %arg8: memref<64x16xf32, #tpu.memory_space<vmem>>) attributes {dimension_semantics = [#tpu.dimension_semantics<parallel>, #tpu.dimension_semantics<parallel>], iteration_bounds = array<i64: 2, 4>, scalar_prefetch = 0 : i64, scratch_operands = 1 : i64, tpu.core_type = #tpu.core_type<tc>, window_params = [{transform_indices = @transform_0, window_bounds = array<i64: 1, 3, 18, 18>}, {transform_indices = @transform_1, window_bounds = array<i64: 432>}, {transform_indices = @transform_2, window_bounds = array<i64: 16>}, {pipeline_mode = #tpu.pipeline_mode<synchronous>, transform_indices = @transform_3, window_bounds = array<i64: 16, 4>}, {pipeline_mode = #tpu.pipeline_mode<synchronous>, transform_indices = @transform_4, window_bounds = array<i64: 16, 64>}, {transform_indices = @transform_5, window_bounds = array<i64: 1, 16, 4>}]} {
    %c108_i32 = arith.constant 108 : i32
    %0 = arith.muli %arg1, %c108_i32 : i32
    %c4_i32 = arith.constant 4 : i32
    %1 = arith.muli %arg1, %c4_i32 : i32
    %c0_i32 = arith.constant 0 : i32
    %c2_i32 = arith.constant 2 : i32
    %2 = arith.addi %c0_i32, %c2_i32 : i32
    %c1_i32 = arith.constant 1 : i32
    scf.for %arg9 = %c0_i32 to %2 step %c1_i32  : i32 {
      %c8_i32 = arith.constant 8 : i32
      %13 = arith.muli %arg9, %c8_i32 : i32
      %c8_i32_10 = arith.constant 8 : i32
      %14 = arith.minsi %13, %c8_i32_10 : i32
      %cst_11 = arith.constant 0.000000e+00 : f32
      %15 = vector.broadcast %cst_11 : f32 to vector<8x16xf32>
      %cst_12 = arith.constant 0.000000e+00 : f32
      %16 = vector.broadcast %cst_12 : f32 to vector<8x16xf32>
      %cst_13 = arith.constant 0.000000e+00 : f32
      %17 = vector.broadcast %cst_13 : f32 to vector<8x16xf32>
      %cst_14 = arith.constant 0.000000e+00 : f32
      %18 = vector.broadcast %cst_14 : f32 to vector<8x16xf32>
      %c0_i32_15 = arith.constant 0 : i32
      %19 = arith.addi %14, %c0_i32_15 : i32
      %c0_16 = arith.constant 0 : index
      %c0_17 = arith.constant 0 : index
      %20 = arith.index_cast %19 : i32 to index
      %c0_18 = arith.constant 0 : index
      %21 = vector.load %arg2[%c0_16, %c0_17, %20, %c0_18] : memref<1x3x18x18xf32, #tpu.memory_space<vmem>>, vector<1x1x8x18xf32>
      %22 = vector.shape_cast %21 : vector<1x1x8x18xf32> to vector<8x18xf32>
      %23 = vector.extract_strided_slice %22 {offsets = [0, 0], sizes = [8, 16], strides = [1, 1]} : vector<8x18xf32> to vector<8x16xf32>
      %c0_i32_19 = arith.constant 0 : i32
      %24 = arith.addi %0, %c0_i32_19 : i32
      %c0_i32_20 = arith.constant 0 : i32
      %25 = arith.addi %24, %c0_i32_20 : i32
      %26 = arith.index_cast %25 : i32 to index
      %27 = memref.load %arg3[%26] : memref<432xf32, #tpu.memory_space<smem>>
      %28 = vector.broadcast %27 : f32 to vector<8x16xf32>
      %29 = arith.mulf %23, %28 : vector<8x16xf32>
      %30 = arith.addf %15, %29 : vector<8x16xf32>
      %c27_i32 = arith.constant 27 : i32
      %31 = arith.addi %0, %c27_i32 : i32
      %c0_i32_21 = arith.constant 0 : i32
      %32 = arith.addi %31, %c0_i32_21 : i32
      %33 = arith.index_cast %32 : i32 to index
      %34 = memref.load %arg3[%33] : memref<432xf32, #tpu.memory_space<smem>>
      %35 = vector.broadcast %34 : f32 to vector<8x16xf32>
      %36 = arith.mulf %23, %35 : vector<8x16xf32>
      %37 = arith.addf %16, %36 : vector<8x16xf32>
      %c54_i32 = arith.constant 54 : i32
      %38 = arith.addi %0, %c54_i32 : i32
      %c0_i32_22 = arith.constant 0 : i32
      %39 = arith.addi %38, %c0_i32_22 : i32
      %40 = arith.index_cast %39 : i32 to index
      %41 = memref.load %arg3[%40] : memref<432xf32, #tpu.memory_space<smem>>
      %42 = vector.broadcast %41 : f32 to vector<8x16xf32>
      %43 = arith.mulf %23, %42 : vector<8x16xf32>
      %44 = arith.addf %17, %43 : vector<8x16xf32>
      %c81_i32 = arith.constant 81 : i32
      %45 = arith.addi %0, %c81_i32 : i32
      %c0_i32_23 = arith.constant 0 : i32
      %46 = arith.addi %45, %c0_i32_23 : i32
      %47 = arith.index_cast %46 : i32 to index
      %48 = memref.load %arg3[%47] : memref<432xf32, #tpu.memory_space<smem>>
      %49 = vector.broadcast %48 : f32 to vector<8x16xf32>
      %50 = arith.mulf %23, %49 : vector<8x16xf32>
      %51 = arith.addf %18, %50 : vector<8x16xf32>
      %52 = vector.extract_strided_slice %22 {offsets = [0, 1], sizes = [8, 16], strides = [1, 1]} : vector<8x18xf32> to vector<8x16xf32>
      %c0_i32_24 = arith.constant 0 : i32
      %53 = arith.addi %0, %c0_i32_24 : i32
      %c1_i32_25 = arith.constant 1 : i32
      %54 = arith.addi %53, %c1_i32_25 : i32
      %55 = arith.index_cast %54 : i32 to index
      %56 = memref.load %arg3[%55] : memref<432xf32, #tpu.memory_space<smem>>
      %57 = vector.broadcast %56 : f32 to vector<8x16xf32>
      %58 = arith.mulf %52, %57 : vector<8x16xf32>
      %59 = arith.addf %30, %58 : vector<8x16xf32>
      %c27_i32_26 = arith.constant 27 : i32
      %60 = arith.addi %0, %c27_i32_26 : i32
      %c1_i32_27 = arith.constant 1 : i32
      %61 = arith.addi %60, %c1_i32_27 : i32
      %62 = arith.index_cast %61 : i32 to index
      %63 = memref.load %arg3[%62] : memref<432xf32, #tpu.memory_space<smem>>
      %64 = vector.broadcast %63 : f32 to vector<8x16xf32>
      %65 = arith.mulf %52, %64 : vector<8x16xf32>
      %66 = arith.addf %37, %65 : vector<8x16xf32>
      %c54_i32_28 = arith.constant 54 : i32
      %67 = arith.addi %0, %c54_i32_28 : i32
      %c1_i32_29 = arith.constant 1 : i32
      %68 = arith.addi %67, %c1_i32_29 : i32
      %69 = arith.index_cast %68 : i32 to index
      %70 = memref.load %arg3[%69] : memref<432xf32, #tpu.memory_space<smem>>
      %71 = vector.broadcast %70 : f32 to vector<8x16xf32>
      %72 = arith.mulf %52, %71 : vector<8x16xf32>
      %73 = arith.addf %44, %72 : vector<8x16xf32>
      %c81_i32_30 = arith.constant 81 : i32
      %74 = arith.addi %0, %c81_i32_30 : i32
      %c1_i32_31 = arith.constant 1 : i32
      %75 = arith.addi %74, %c1_i32_31 : i32
      %76 = arith.index_cast %75 : i32 to index
      %77 = memref.load %arg3[%76] : memref<432xf32, #tpu.memory_space<smem>>
      %78 = vector.broadcast %77 : f32 to vector<8x16xf32>
      %79 = arith.mulf %52, %78 : vector<8x16xf32>
      %80 = arith.addf %51, %79 : vector<8x16xf32>
      %81 = vector.extract_strided_slice %22 {offsets = [0, 2], sizes = [8, 16], strides = [1, 1]} : vector<8x18xf32> to vector<8x16xf32>
      %c0_i32_32 = arith.constant 0 : i32
      %82 = arith.addi %0, %c0_i32_32 : i32
      %c2_i32_33 = arith.constant 2 : i32
      %83 = arith.addi %82, %c2_i32_33 : i32
      %84 = arith.index_cast %83 : i32 to index
      %85 = memref.load %arg3[%84] : memref<432xf32, #tpu.memory_space<smem>>
      %86 = vector.broadcast %85 : f32 to vector<8x16xf32>
      %87 = arith.mulf %81, %86 : vector<8x16xf32>
      %88 = arith.addf %59, %87 : vector<8x16xf32>
      %c27_i32_34 = arith.constant 27 : i32
      %89 = arith.addi %0, %c27_i32_34 : i32
      %c2_i32_35 = arith.constant 2 : i32
      %90 = arith.addi %89, %c2_i32_35 : i32
      %91 = arith.index_cast %90 : i32 to index
      %92 = memref.load %arg3[%91] : memref<432xf32, #tpu.memory_space<smem>>
      %93 = vector.broadcast %92 : f32 to vector<8x16xf32>
      %94 = arith.mulf %81, %93 : vector<8x16xf32>
      %95 = arith.addf %66, %94 : vector<8x16xf32>
      %c54_i32_36 = arith.constant 54 : i32
      %96 = arith.addi %0, %c54_i32_36 : i32
      %c2_i32_37 = arith.constant 2 : i32
      %97 = arith.addi %96, %c2_i32_37 : i32
      %98 = arith.index_cast %97 : i32 to index
      %99 = memref.load %arg3[%98] : memref<432xf32, #tpu.memory_space<smem>>
      %100 = vector.broadcast %99 : f32 to vector<8x16xf32>
      %101 = arith.mulf %81, %100 : vector<8x16xf32>
      %102 = arith.addf %73, %101 : vector<8x16xf32>
      %c81_i32_38 = arith.constant 81 : i32
      %103 = arith.addi %0, %c81_i32_38 : i32
      %c2_i32_39 = arith.constant 2 : i32
      %104 = arith.addi %103, %c2_i32_39 : i32
      %105 = arith.index_cast %104 : i32 to index
      %106 = memref.load %arg3[%105] : memref<432xf32, #tpu.memory_space<smem>>
      %107 = vector.broadcast %106 : f32 to vector<8x16xf32>
      %108 = arith.mulf %81, %107 : vector<8x16xf32>
      %109 = arith.addf %80, %108 : vector<8x16xf32>
      %c1_i32_40 = arith.constant 1 : i32
      %110 = arith.addi %14, %c1_i32_40 : i32
      %c0_41 = arith.constant 0 : index
      %c0_42 = arith.constant 0 : index
      %111 = arith.index_cast %110 : i32 to index
      %c0_43 = arith.constant 0 : index
      %112 = vector.load %arg2[%c0_41, %c0_42, %111, %c0_43] : memref<1x3x18x18xf32, #tpu.memory_space<vmem>>, vector<1x1x8x18xf32>
      %113 = vector.shape_cast %112 : vector<1x1x8x18xf32> to vector<8x18xf32>
      %114 = vector.extract_strided_slice %113 {offsets = [0, 0], sizes = [8, 16], strides = [1, 1]} : vector<8x18xf32> to vector<8x16xf32>
      %c0_i32_44 = arith.constant 0 : i32
      %115 = arith.addi %0, %c0_i32_44 : i32
      %c3_i32 = arith.constant 3 : i32
      %116 = arith.addi %115, %c3_i32 : i32
      %117 = arith.index_cast %116 : i32 to index
      %118 = memref.load %arg3[%117] : memref<432xf32, #tpu.memory_space<smem>>
      %119 = vector.broadcast %118 : f32 to vector<8x16xf32>
      %120 = arith.mulf %114, %119 : vector<8x16xf32>
      %121 = arith.addf %88, %120 : vector<8x16xf32>
      %c27_i32_45 = arith.constant 27 : i32
      %122 = arith.addi %0, %c27_i32_45 : i32
      %c3_i32_46 = arith.constant 3 : i32
      %123 = arith.addi %122, %c3_i32_46 : i32
      %124 = arith.index_cast %123 : i32 to index
      %125 = memref.load %arg3[%124] : memref<432xf32, #tpu.memory_space<smem>>
      %126 = vector.broadcast %125 : f32 to vector<8x16xf32>
      %127 = arith.mulf %114, %126 : vector<8x16xf32>
      %128 = arith.addf %95, %127 : vector<8x16xf32>
      %c54_i32_47 = arith.constant 54 : i32
      %129 = arith.addi %0, %c54_i32_47 : i32
      %c3_i32_48 = arith.constant 3 : i32
      %130 = arith.addi %129, %c3_i32_48 : i32
      %131 = arith.index_cast %130 : i32 to index
      %132 = memref.load %arg3[%131] : memref<432xf32, #tpu.memory_space<smem>>
      %133 = vector.broadcast %132 : f32 to vector<8x16xf32>
      %134 = arith.mulf %114, %133 : vector<8x16xf32>
      %135 = arith.addf %102, %134 : vector<8x16xf32>
      %c81_i32_49 = arith.constant 81 : i32
      %136 = arith.addi %0, %c81_i32_49 : i32
      %c3_i32_50 = arith.constant 3 : i32
      %137 = arith.addi %136, %c3_i32_50 : i32
      %138 = arith.index_cast %137 : i32 to index
      %139 = memref.load %arg3[%138] : memref<432xf32, #tpu.memory_space<smem>>
      %140 = vector.broadcast %139 : f32 to vector<8x16xf32>
      %141 = arith.mulf %114, %140 : vector<8x16xf32>
      %142 = arith.addf %109, %141 : vector<8x16xf32>
      %143 = vector.extract_strided_slice %113 {offsets = [0, 1], sizes = [8, 16], strides = [1, 1]} : vector<8x18xf32> to vector<8x16xf32>
      %c0_i32_51 = arith.constant 0 : i32
      %144 = arith.addi %0, %c0_i32_51 : i32
      %c4_i32_52 = arith.constant 4 : i32
      %145 = arith.addi %144, %c4_i32_52 : i32
      %146 = arith.index_cast %145 : i32 to index
      %147 = memref.load %arg3[%146] : memref<432xf32, #tpu.memory_space<smem>>
      %148 = vector.broadcast %147 : f32 to vector<8x16xf32>
      %149 = arith.mulf %143, %148 : vector<8x16xf32>
      %150 = arith.addf %121, %149 : vector<8x16xf32>
      %c27_i32_53 = arith.constant 27 : i32
      %151 = arith.addi %0, %c27_i32_53 : i32
      %c4_i32_54 = arith.constant 4 : i32
      %152 = arith.addi %151, %c4_i32_54 : i32
      %153 = arith.index_cast %152 : i32 to index
      %154 = memref.load %arg3[%153] : memref<432xf32, #tpu.memory_space<smem>>
      %155 = vector.broadcast %154 : f32 to vector<8x16xf32>
      %156 = arith.mulf %143, %155 : vector<8x16xf32>
      %157 = arith.addf %128, %156 : vector<8x16xf32>
      %c54_i32_55 = arith.constant 54 : i32
      %158 = arith.addi %0, %c54_i32_55 : i32
      %c4_i32_56 = arith.constant 4 : i32
      %159 = arith.addi %158, %c4_i32_56 : i32
      %160 = arith.index_cast %159 : i32 to index
      %161 = memref.load %arg3[%160] : memref<432xf32, #tpu.memory_space<smem>>
      %162 = vector.broadcast %161 : f32 to vector<8x16xf32>
      %163 = arith.mulf %143, %162 : vector<8x16xf32>
      %164 = arith.addf %135, %163 : vector<8x16xf32>
      %c81_i32_57 = arith.constant 81 : i32
      %165 = arith.addi %0, %c81_i32_57 : i32
      %c4_i32_58 = arith.constant 4 : i32
      %166 = arith.addi %165, %c4_i32_58 : i32
      %167 = arith.index_cast %166 : i32 to index
      %168 = memref.load %arg3[%167] : memref<432xf32, #tpu.memory_space<smem>>
      %169 = vector.broadcast %168 : f32 to vector<8x16xf32>
      %170 = arith.mulf %143, %169 : vector<8x16xf32>
      %171 = arith.addf %142, %170 : vector<8x16xf32>
      %172 = vector.extract_strided_slice %113 {offsets = [0, 2], sizes = [8, 16], strides = [1, 1]} : vector<8x18xf32> to vector<8x16xf32>
      %c0_i32_59 = arith.constant 0 : i32
      %173 = arith.addi %0, %c0_i32_59 : i32
      %c5_i32 = arith.constant 5 : i32
      %174 = arith.addi %173, %c5_i32 : i32
      %175 = arith.index_cast %174 : i32 to index
      %176 = memref.load %arg3[%175] : memref<432xf32, #tpu.memory_space<smem>>
      %177 = vector.broadcast %176 : f32 to vector<8x16xf32>
      %178 = arith.mulf %172, %177 : vector<8x16xf32>
      %179 = arith.addf %150, %178 : vector<8x16xf32>
      %c27_i32_60 = arith.constant 27 : i32
      %180 = arith.addi %0, %c27_i32_60 : i32
      %c5_i32_61 = arith.constant 5 : i32
      %181 = arith.addi %180, %c5_i32_61 : i32
      %182 = arith.index_cast %181 : i32 to index
      %183 = memref.load %arg3[%182] : memref<432xf32, #tpu.memory_space<smem>>
      %184 = vector.broadcast %183 : f32 to vector<8x16xf32>
      %185 = arith.mulf %172, %184 : vector<8x16xf32>
      %186 = arith.addf %157, %185 : vector<8x16xf32>
      %c54_i32_62 = arith.constant 54 : i32
      %187 = arith.addi %0, %c54_i32_62 : i32
      %c5_i32_63 = arith.constant 5 : i32
      %188 = arith.addi %187, %c5_i32_63 : i32
      %189 = arith.index_cast %188 : i32 to index
      %190 = memref.load %arg3[%189] : memref<432xf32, #tpu.memory_space<smem>>
      %191 = vector.broadcast %190 : f32 to vector<8x16xf32>
      %192 = arith.mulf %172, %191 : vector<8x16xf32>
      %193 = arith.addf %164, %192 : vector<8x16xf32>
      %c81_i32_64 = arith.constant 81 : i32
      %194 = arith.addi %0, %c81_i32_64 : i32
      %c5_i32_65 = arith.constant 5 : i32
      %195 = arith.addi %194, %c5_i32_65 : i32
      %196 = arith.index_cast %195 : i32 to index
      %197 = memref.load %arg3[%196] : memref<432xf32, #tpu.memory_space<smem>>
      %198 = vector.broadcast %197 : f32 to vector<8x16xf32>
      %199 = arith.mulf %172, %198 : vector<8x16xf32>
      %200 = arith.addf %171, %199 : vector<8x16xf32>
      %c2_i32_66 = arith.constant 2 : i32
      %201 = arith.addi %14, %c2_i32_66 : i32
      %c0_67 = arith.constant 0 : index
      %c0_68 = arith.constant 0 : index
      %202 = arith.index_cast %201 : i32 to index
      %c0_69 = arith.constant 0 : index
      %203 = vector.load %arg2[%c0_67, %c0_68, %202, %c0_69] : memref<1x3x18x18xf32, #tpu.memory_space<vmem>>, vector<1x1x8x18xf32>
      %204 = vector.shape_cast %203 : vector<1x1x8x18xf32> to vector<8x18xf32>
      %205 = vector.extract_strided_slice %204 {offsets = [0, 0], sizes = [8, 16], strides = [1, 1]} : vector<8x18xf32> to vector<8x16xf32>
      %c0_i32_70 = arith.constant 0 : i32
      %206 = arith.addi %0, %c0_i32_70 : i32
      %c6_i32 = arith.constant 6 : i32
      %207 = arith.addi %206, %c6_i32 : i32
      %208 = arith.index_cast %207 : i32 to index
      %209 = memref.load %arg3[%208] : memref<432xf32, #tpu.memory_space<smem>>
      %210 = vector.broadcast %209 : f32 to vector<8x16xf32>
      %211 = arith.mulf %205, %210 : vector<8x16xf32>
      %212 = arith.addf %179, %211 : vector<8x16xf32>
      %c27_i32_71 = arith.constant 27 : i32
      %213 = arith.addi %0, %c27_i32_71 : i32
      %c6_i32_72 = arith.constant 6 : i32
      %214 = arith.addi %213, %c6_i32_72 : i32
      %215 = arith.index_cast %214 : i32 to index
      %216 = memref.load %arg3[%215] : memref<432xf32, #tpu.memory_space<smem>>
      %217 = vector.broadcast %216 : f32 to vector<8x16xf32>
      %218 = arith.mulf %205, %217 : vector<8x16xf32>
      %219 = arith.addf %186, %218 : vector<8x16xf32>
      %c54_i32_73 = arith.constant 54 : i32
      %220 = arith.addi %0, %c54_i32_73 : i32
      %c6_i32_74 = arith.constant 6 : i32
      %221 = arith.addi %220, %c6_i32_74 : i32
      %222 = arith.index_cast %221 : i32 to index
      %223 = memref.load %arg3[%222] : memref<432xf32, #tpu.memory_space<smem>>
      %224 = vector.broadcast %223 : f32 to vector<8x16xf32>
      %225 = arith.mulf %205, %224 : vector<8x16xf32>
      %226 = arith.addf %193, %225 : vector<8x16xf32>
      %c81_i32_75 = arith.constant 81 : i32
      %227 = arith.addi %0, %c81_i32_75 : i32
      %c6_i32_76 = arith.constant 6 : i32
      %228 = arith.addi %227, %c6_i32_76 : i32
      %229 = arith.index_cast %228 : i32 to index
      %230 = memref.load %arg3[%229] : memref<432xf32, #tpu.memory_space<smem>>
      %231 = vector.broadcast %230 : f32 to vector<8x16xf32>
      %232 = arith.mulf %205, %231 : vector<8x16xf32>
      %233 = arith.addf %200, %232 : vector<8x16xf32>
      %234 = vector.extract_strided_slice %204 {offsets = [0, 1], sizes = [8, 16], strides = [1, 1]} : vector<8x18xf32> to vector<8x16xf32>
      %c0_i32_77 = arith.constant 0 : i32
      %235 = arith.addi %0, %c0_i32_77 : i32
      %c7_i32 = arith.constant 7 : i32
      %236 = arith.addi %235, %c7_i32 : i32
      %237 = arith.index_cast %236 : i32 to index
      %238 = memref.load %arg3[%237] : memref<432xf32, #tpu.memory_space<smem>>
      %239 = vector.broadcast %238 : f32 to vector<8x16xf32>
      %240 = arith.mulf %234, %239 : vector<8x16xf32>
      %241 = arith.addf %212, %240 : vector<8x16xf32>
      %c27_i32_78 = arith.constant 27 : i32
      %242 = arith.addi %0, %c27_i32_78 : i32
      %c7_i32_79 = arith.constant 7 : i32
      %243 = arith.addi %242, %c7_i32_79 : i32
      %244 = arith.index_cast %243 : i32 to index
      %245 = memref.load %arg3[%244] : memref<432xf32, #tpu.memory_space<smem>>
      %246 = vector.broadcast %245 : f32 to vector<8x16xf32>
      %247 = arith.mulf %234, %246 : vector<8x16xf32>
      %248 = arith.addf %219, %247 : vector<8x16xf32>
      %c54_i32_80 = arith.constant 54 : i32
      %249 = arith.addi %0, %c54_i32_80 : i32
      %c7_i32_81 = arith.constant 7 : i32
      %250 = arith.addi %249, %c7_i32_81 : i32
      %251 = arith.index_cast %250 : i32 to index
      %252 = memref.load %arg3[%251] : memref<432xf32, #tpu.memory_space<smem>>
      %253 = vector.broadcast %252 : f32 to vector<8x16xf32>
      %254 = arith.mulf %234, %253 : vector<8x16xf32>
      %255 = arith.addf %226, %254 : vector<8x16xf32>
      %c81_i32_82 = arith.constant 81 : i32
      %256 = arith.addi %0, %c81_i32_82 : i32
      %c7_i32_83 = arith.constant 7 : i32
      %257 = arith.addi %256, %c7_i32_83 : i32
      %258 = arith.index_cast %257 : i32 to index
      %259 = memref.load %arg3[%258] : memref<432xf32, #tpu.memory_space<smem>>
      %260 = vector.broadcast %259 : f32 to vector<8x16xf32>
      %261 = arith.mulf %234, %260 : vector<8x16xf32>
      %262 = arith.addf %233, %261 : vector<8x16xf32>
      %263 = vector.extract_strided_slice %204 {offsets = [0, 2], sizes = [8, 16], strides = [1, 1]} : vector<8x18xf32> to vector<8x16xf32>
      %c0_i32_84 = arith.constant 0 : i32
      %264 = arith.addi %0, %c0_i32_84 : i32
      %c8_i32_85 = arith.constant 8 : i32
      %265 = arith.addi %264, %c8_i32_85 : i32
      %266 = arith.index_cast %265 : i32 to index
      %267 = memref.load %arg3[%266] : memref<432xf32, #tpu.memory_space<smem>>
      %268 = vector.broadcast %267 : f32 to vector<8x16xf32>
      %269 = arith.mulf %263, %268 : vector<8x16xf32>
      %270 = arith.addf %241, %269 : vector<8x16xf32>
      %c27_i32_86 = arith.constant 27 : i32
      %271 = arith.addi %0, %c27_i32_86 : i32
      %c8_i32_87 = arith.constant 8 : i32
      %272 = arith.addi %271, %c8_i32_87 : i32
      %273 = arith.index_cast %272 : i32 to index
      %274 = memref.load %arg3[%273] : memref<432xf32, #tpu.memory_space<smem>>
      %275 = vector.broadcast %274 : f32 to vector<8x16xf32>
      %276 = arith.mulf %263, %275 : vector<8x16xf32>
      %277 = arith.addf %248, %276 : vector<8x16xf32>
      %c54_i32_88 = arith.constant 54 : i32
      %278 = arith.addi %0, %c54_i32_88 : i32
      %c8_i32_89 = arith.constant 8 : i32
      %279 = arith.addi %278, %c8_i32_89 : i32
      %280 = arith.index_cast %279 : i32 to index
      %281 = memref.load %arg3[%280] : memref<432xf32, #tpu.memory_space<smem>>
      %282 = vector.broadcast %281 : f32 to vector<8x16xf32>
      %283 = arith.mulf %263, %282 : vector<8x16xf32>
      %284 = arith.addf %255, %283 : vector<8x16xf32>
      %c81_i32_90 = arith.constant 81 : i32
      %285 = arith.addi %0, %c81_i32_90 : i32
      %c8_i32_91 = arith.constant 8 : i32
      %286 = arith.addi %285, %c8_i32_91 : i32
      %287 = arith.index_cast %286 : i32 to index
      %288 = memref.load %arg3[%287] : memref<432xf32, #tpu.memory_space<smem>>
      %289 = vector.broadcast %288 : f32 to vector<8x16xf32>
      %290 = arith.mulf %263, %289 : vector<8x16xf32>
      %291 = arith.addf %262, %290 : vector<8x16xf32>
      %c0_i32_92 = arith.constant 0 : i32
      %292 = arith.addi %14, %c0_i32_92 : i32
      %c0_93 = arith.constant 0 : index
      %c1 = arith.constant 1 : index
      %293 = arith.index_cast %292 : i32 to index
      %c0_94 = arith.constant 0 : index
      %294 = vector.load %arg2[%c0_93, %c1, %293, %c0_94] : memref<1x3x18x18xf32, #tpu.memory_space<vmem>>, vector<1x1x8x18xf32>
      %295 = vector.shape_cast %294 : vector<1x1x8x18xf32> to vector<8x18xf32>
      %296 = vector.extract_strided_slice %295 {offsets = [0, 0], sizes = [8, 16], strides = [1, 1]} : vector<8x18xf32> to vector<8x16xf32>
      %c0_i32_95 = arith.constant 0 : i32
      %297 = arith.addi %0, %c0_i32_95 : i32
      %c9_i32 = arith.constant 9 : i32
      %298 = arith.addi %297, %c9_i32 : i32
      %299 = arith.index_cast %298 : i32 to index
      %300 = memref.load %arg3[%299] : memref<432xf32, #tpu.memory_space<smem>>
      %301 = vector.broadcast %300 : f32 to vector<8x16xf32>
      %302 = arith.mulf %296, %301 : vector<8x16xf32>
      %303 = arith.addf %270, %302 : vector<8x16xf32>
      %c27_i32_96 = arith.constant 27 : i32
      %304 = arith.addi %0, %c27_i32_96 : i32
      %c9_i32_97 = arith.constant 9 : i32
      %305 = arith.addi %304, %c9_i32_97 : i32
      %306 = arith.index_cast %305 : i32 to index
      %307 = memref.load %arg3[%306] : memref<432xf32, #tpu.memory_space<smem>>
      %308 = vector.broadcast %307 : f32 to vector<8x16xf32>
      %309 = arith.mulf %296, %308 : vector<8x16xf32>
      %310 = arith.addf %277, %309 : vector<8x16xf32>
      %c54_i32_98 = arith.constant 54 : i32
      %311 = arith.addi %0, %c54_i32_98 : i32
      %c9_i32_99 = arith.constant 9 : i32
      %312 = arith.addi %311, %c9_i32_99 : i32
      %313 = arith.index_cast %312 : i32 to index
      %314 = memref.load %arg3[%313] : memref<432xf32, #tpu.memory_space<smem>>
      %315 = vector.broadcast %314 : f32 to vector<8x16xf32>
      %316 = arith.mulf %296, %315 : vector<8x16xf32>
      %317 = arith.addf %284, %316 : vector<8x16xf32>
      %c81_i32_100 = arith.constant 81 : i32
      %318 = arith.addi %0, %c81_i32_100 : i32
      %c9_i32_101 = arith.constant 9 : i32
      %319 = arith.addi %318, %c9_i32_101 : i32
      %320 = arith.index_cast %319 : i32 to index
      %321 = memref.load %arg3[%320] : memref<432xf32, #tpu.memory_space<smem>>
      %322 = vector.broadcast %321 : f32 to vector<8x16xf32>
      %323 = arith.mulf %296, %322 : vector<8x16xf32>
      %324 = arith.addf %291, %323 : vector<8x16xf32>
      %325 = vector.extract_strided_slice %295 {offsets = [0, 1], sizes = [8, 16], strides = [1, 1]} : vector<8x18xf32> to vector<8x16xf32>
      %c0_i32_102 = arith.constant 0 : i32
      %326 = arith.addi %0, %c0_i32_102 : i32
      %c10_i32 = arith.constant 10 : i32
      %327 = arith.addi %326, %c10_i32 : i32
      %328 = arith.index_cast %327 : i32 to index
      %329 = memref.load %arg3[%328] : memref<432xf32, #tpu.memory_space<smem>>
      %330 = vector.broadcast %329 : f32 to vector<8x16xf32>
      %331 = arith.mulf %325, %330 : vector<8x16xf32>
      %332 = arith.addf %303, %331 : vector<8x16xf32>
      %c27_i32_103 = arith.constant 27 : i32
      %333 = arith.addi %0, %c27_i32_103 : i32
      %c10_i32_104 = arith.constant 10 : i32
      %334 = arith.addi %333, %c10_i32_104 : i32
      %335 = arith.index_cast %334 : i32 to index
      %336 = memref.load %arg3[%335] : memref<432xf32, #tpu.memory_space<smem>>
      %337 = vector.broadcast %336 : f32 to vector<8x16xf32>
      %338 = arith.mulf %325, %337 : vector<8x16xf32>
      %339 = arith.addf %310, %338 : vector<8x16xf32>
      %c54_i32_105 = arith.constant 54 : i32
      %340 = arith.addi %0, %c54_i32_105 : i32
      %c10_i32_106 = arith.constant 10 : i32
      %341 = arith.addi %340, %c10_i32_106 : i32
      %342 = arith.index_cast %341 : i32 to index
      %343 = memref.load %arg3[%342] : memref<432xf32, #tpu.memory_space<smem>>
      %344 = vector.broadcast %343 : f32 to vector<8x16xf32>
      %345 = arith.mulf %325, %344 : vector<8x16xf32>
      %346 = arith.addf %317, %345 : vector<8x16xf32>
      %c81_i32_107 = arith.constant 81 : i32
      %347 = arith.addi %0, %c81_i32_107 : i32
      %c10_i32_108 = arith.constant 10 : i32
      %348 = arith.addi %347, %c10_i32_108 : i32
      %349 = arith.index_cast %348 : i32 to index
      %350 = memref.load %arg3[%349] : memref<432xf32, #tpu.memory_space<smem>>
      %351 = vector.broadcast %350 : f32 to vector<8x16xf32>
      %352 = arith.mulf %325, %351 : vector<8x16xf32>
      %353 = arith.addf %324, %352 : vector<8x16xf32>
      %354 = vector.extract_strided_slice %295 {offsets = [0, 2], sizes = [8, 16], strides = [1, 1]} : vector<8x18xf32> to vector<8x16xf32>
      %c0_i32_109 = arith.constant 0 : i32
      %355 = arith.addi %0, %c0_i32_109 : i32
      %c11_i32 = arith.constant 11 : i32
      %356 = arith.addi %355, %c11_i32 : i32
      %357 = arith.index_cast %356 : i32 to index
      %358 = memref.load %arg3[%357] : memref<432xf32, #tpu.memory_space<smem>>
      %359 = vector.broadcast %358 : f32 to vector<8x16xf32>
      %360 = arith.mulf %354, %359 : vector<8x16xf32>
      %361 = arith.addf %332, %360 : vector<8x16xf32>
      %c27_i32_110 = arith.constant 27 : i32
      %362 = arith.addi %0, %c27_i32_110 : i32
      %c11_i32_111 = arith.constant 11 : i32
      %363 = arith.addi %362, %c11_i32_111 : i32
      %364 = arith.index_cast %363 : i32 to index
      %365 = memref.load %arg3[%364] : memref<432xf32, #tpu.memory_space<smem>>
      %366 = vector.broadcast %365 : f32 to vector<8x16xf32>
      %367 = arith.mulf %354, %366 : vector<8x16xf32>
      %368 = arith.addf %339, %367 : vector<8x16xf32>
      %c54_i32_112 = arith.constant 54 : i32
      %369 = arith.addi %0, %c54_i32_112 : i32
      %c11_i32_113 = arith.constant 11 : i32
      %370 = arith.addi %369, %c11_i32_113 : i32
      %371 = arith.index_cast %370 : i32 to index
      %372 = memref.load %arg3[%371] : memref<432xf32, #tpu.memory_space<smem>>
      %373 = vector.broadcast %372 : f32 to vector<8x16xf32>
      %374 = arith.mulf %354, %373 : vector<8x16xf32>
      %375 = arith.addf %346, %374 : vector<8x16xf32>
      %c81_i32_114 = arith.constant 81 : i32
      %376 = arith.addi %0, %c81_i32_114 : i32
      %c11_i32_115 = arith.constant 11 : i32
      %377 = arith.addi %376, %c11_i32_115 : i32
      %378 = arith.index_cast %377 : i32 to index
      %379 = memref.load %arg3[%378] : memref<432xf32, #tpu.memory_space<smem>>
      %380 = vector.broadcast %379 : f32 to vector<8x16xf32>
      %381 = arith.mulf %354, %380 : vector<8x16xf32>
      %382 = arith.addf %353, %381 : vector<8x16xf32>
      %c1_i32_116 = arith.constant 1 : i32
      %383 = arith.addi %14, %c1_i32_116 : i32
      %c0_117 = arith.constant 0 : index
      %c1_118 = arith.constant 1 : index
      %384 = arith.index_cast %383 : i32 to index
      %c0_119 = arith.constant 0 : index
      %385 = vector.load %arg2[%c0_117, %c1_118, %384, %c0_119] : memref<1x3x18x18xf32, #tpu.memory_space<vmem>>, vector<1x1x8x18xf32>
      %386 = vector.shape_cast %385 : vector<1x1x8x18xf32> to vector<8x18xf32>
      %387 = vector.extract_strided_slice %386 {offsets = [0, 0], sizes = [8, 16], strides = [1, 1]} : vector<8x18xf32> to vector<8x16xf32>
      %c0_i32_120 = arith.constant 0 : i32
      %388 = arith.addi %0, %c0_i32_120 : i32
      %c12_i32 = arith.constant 12 : i32
      %389 = arith.addi %388, %c12_i32 : i32
      %390 = arith.index_cast %389 : i32 to index
      %391 = memref.load %arg3[%390] : memref<432xf32, #tpu.memory_space<smem>>
      %392 = vector.broadcast %391 : f32 to vector<8x16xf32>
      %393 = arith.mulf %387, %392 : vector<8x16xf32>
      %394 = arith.addf %361, %393 : vector<8x16xf32>
      %c27_i32_121 = arith.constant 27 : i32
      %395 = arith.addi %0, %c27_i32_121 : i32
      %c12_i32_122 = arith.constant 12 : i32
      %396 = arith.addi %395, %c12_i32_122 : i32
      %397 = arith.index_cast %396 : i32 to index
      %398 = memref.load %arg3[%397] : memref<432xf32, #tpu.memory_space<smem>>
      %399 = vector.broadcast %398 : f32 to vector<8x16xf32>
      %400 = arith.mulf %387, %399 : vector<8x16xf32>
      %401 = arith.addf %368, %400 : vector<8x16xf32>
      %c54_i32_123 = arith.constant 54 : i32
      %402 = arith.addi %0, %c54_i32_123 : i32
      %c12_i32_124 = arith.constant 12 : i32
      %403 = arith.addi %402, %c12_i32_124 : i32
      %404 = arith.index_cast %403 : i32 to index
      %405 = memref.load %arg3[%404] : memref<432xf32, #tpu.memory_space<smem>>
      %406 = vector.broadcast %405 : f32 to vector<8x16xf32>
      %407 = arith.mulf %387, %406 : vector<8x16xf32>
      %408 = arith.addf %375, %407 : vector<8x16xf32>
      %c81_i32_125 = arith.constant 81 : i32
      %409 = arith.addi %0, %c81_i32_125 : i32
      %c12_i32_126 = arith.constant 12 : i32
      %410 = arith.addi %409, %c12_i32_126 : i32
      %411 = arith.index_cast %410 : i32 to index
      %412 = memref.load %arg3[%411] : memref<432xf32, #tpu.memory_space<smem>>
      %413 = vector.broadcast %412 : f32 to vector<8x16xf32>
      %414 = arith.mulf %387, %413 : vector<8x16xf32>
      %415 = arith.addf %382, %414 : vector<8x16xf32>
      %416 = vector.extract_strided_slice %386 {offsets = [0, 1], sizes = [8, 16], strides = [1, 1]} : vector<8x18xf32> to vector<8x16xf32>
      %c0_i32_127 = arith.constant 0 : i32
      %417 = arith.addi %0, %c0_i32_127 : i32
      %c13_i32 = arith.constant 13 : i32
      %418 = arith.addi %417, %c13_i32 : i32
      %419 = arith.index_cast %418 : i32 to index
      %420 = memref.load %arg3[%419] : memref<432xf32, #tpu.memory_space<smem>>
      %421 = vector.broadcast %420 : f32 to vector<8x16xf32>
      %422 = arith.mulf %416, %421 : vector<8x16xf32>
      %423 = arith.addf %394, %422 : vector<8x16xf32>
      %c27_i32_128 = arith.constant 27 : i32
      %424 = arith.addi %0, %c27_i32_128 : i32
      %c13_i32_129 = arith.constant 13 : i32
      %425 = arith.addi %424, %c13_i32_129 : i32
      %426 = arith.index_cast %425 : i32 to index
      %427 = memref.load %arg3[%426] : memref<432xf32, #tpu.memory_space<smem>>
      %428 = vector.broadcast %427 : f32 to vector<8x16xf32>
      %429 = arith.mulf %416, %428 : vector<8x16xf32>
      %430 = arith.addf %401, %429 : vector<8x16xf32>
      %c54_i32_130 = arith.constant 54 : i32
      %431 = arith.addi %0, %c54_i32_130 : i32
      %c13_i32_131 = arith.constant 13 : i32
      %432 = arith.addi %431, %c13_i32_131 : i32
      %433 = arith.index_cast %432 : i32 to index
      %434 = memref.load %arg3[%433] : memref<432xf32, #tpu.memory_space<smem>>
      %435 = vector.broadcast %434 : f32 to vector<8x16xf32>
      %436 = arith.mulf %416, %435 : vector<8x16xf32>
      %437 = arith.addf %408, %436 : vector<8x16xf32>
      %c81_i32_132 = arith.constant 81 : i32
      %438 = arith.addi %0, %c81_i32_132 : i32
      %c13_i32_133 = arith.constant 13 : i32
      %439 = arith.addi %438, %c13_i32_133 : i32
      %440 = arith.index_cast %439 : i32 to index
      %441 = memref.load %arg3[%440] : memref<432xf32, #tpu.memory_space<smem>>
      %442 = vector.broadcast %441 : f32 to vector<8x16xf32>
      %443 = arith.mulf %416, %442 : vector<8x16xf32>
      %444 = arith.addf %415, %443 : vector<8x16xf32>
      %445 = vector.extract_strided_slice %386 {offsets = [0, 2], sizes = [8, 16], strides = [1, 1]} : vector<8x18xf32> to vector<8x16xf32>
      %c0_i32_134 = arith.constant 0 : i32
      %446 = arith.addi %0, %c0_i32_134 : i32
      %c14_i32 = arith.constant 14 : i32
      %447 = arith.addi %446, %c14_i32 : i32
      %448 = arith.index_cast %447 : i32 to index
      %449 = memref.load %arg3[%448] : memref<432xf32, #tpu.memory_space<smem>>
      %450 = vector.broadcast %449 : f32 to vector<8x16xf32>
      %451 = arith.mulf %445, %450 : vector<8x16xf32>
      %452 = arith.addf %423, %451 : vector<8x16xf32>
      %c27_i32_135 = arith.constant 27 : i32
      %453 = arith.addi %0, %c27_i32_135 : i32
      %c14_i32_136 = arith.constant 14 : i32
      %454 = arith.addi %453, %c14_i32_136 : i32
      %455 = arith.index_cast %454 : i32 to index
      %456 = memref.load %arg3[%455] : memref<432xf32, #tpu.memory_space<smem>>
      %457 = vector.broadcast %456 : f32 to vector<8x16xf32>
      %458 = arith.mulf %445, %457 : vector<8x16xf32>
      %459 = arith.addf %430, %458 : vector<8x16xf32>
      %c54_i32_137 = arith.constant 54 : i32
      %460 = arith.addi %0, %c54_i32_137 : i32
      %c14_i32_138 = arith.constant 14 : i32
      %461 = arith.addi %460, %c14_i32_138 : i32
      %462 = arith.index_cast %461 : i32 to index
      %463 = memref.load %arg3[%462] : memref<432xf32, #tpu.memory_space<smem>>
      %464 = vector.broadcast %463 : f32 to vector<8x16xf32>
      %465 = arith.mulf %445, %464 : vector<8x16xf32>
      %466 = arith.addf %437, %465 : vector<8x16xf32>
      %c81_i32_139 = arith.constant 81 : i32
      %467 = arith.addi %0, %c81_i32_139 : i32
      %c14_i32_140 = arith.constant 14 : i32
      %468 = arith.addi %467, %c14_i32_140 : i32
      %469 = arith.index_cast %468 : i32 to index
      %470 = memref.load %arg3[%469] : memref<432xf32, #tpu.memory_space<smem>>
      %471 = vector.broadcast %470 : f32 to vector<8x16xf32>
      %472 = arith.mulf %445, %471 : vector<8x16xf32>
      %473 = arith.addf %444, %472 : vector<8x16xf32>
      %c2_i32_141 = arith.constant 2 : i32
      %474 = arith.addi %14, %c2_i32_141 : i32
      %c0_142 = arith.constant 0 : index
      %c1_143 = arith.constant 1 : index
      %475 = arith.index_cast %474 : i32 to index
      %c0_144 = arith.constant 0 : index
      %476 = vector.load %arg2[%c0_142, %c1_143, %475, %c0_144] : memref<1x3x18x18xf32, #tpu.memory_space<vmem>>, vector<1x1x8x18xf32>
      %477 = vector.shape_cast %476 : vector<1x1x8x18xf32> to vector<8x18xf32>
      %478 = vector.extract_strided_slice %477 {offsets = [0, 0], sizes = [8, 16], strides = [1, 1]} : vector<8x18xf32> to vector<8x16xf32>
      %c0_i32_145 = arith.constant 0 : i32
      %479 = arith.addi %0, %c0_i32_145 : i32
      %c15_i32 = arith.constant 15 : i32
      %480 = arith.addi %479, %c15_i32 : i32
      %481 = arith.index_cast %480 : i32 to index
      %482 = memref.load %arg3[%481] : memref<432xf32, #tpu.memory_space<smem>>
      %483 = vector.broadcast %482 : f32 to vector<8x16xf32>
      %484 = arith.mulf %478, %483 : vector<8x16xf32>
      %485 = arith.addf %452, %484 : vector<8x16xf32>
      %c27_i32_146 = arith.constant 27 : i32
      %486 = arith.addi %0, %c27_i32_146 : i32
      %c15_i32_147 = arith.constant 15 : i32
      %487 = arith.addi %486, %c15_i32_147 : i32
      %488 = arith.index_cast %487 : i32 to index
      %489 = memref.load %arg3[%488] : memref<432xf32, #tpu.memory_space<smem>>
      %490 = vector.broadcast %489 : f32 to vector<8x16xf32>
      %491 = arith.mulf %478, %490 : vector<8x16xf32>
      %492 = arith.addf %459, %491 : vector<8x16xf32>
      %c54_i32_148 = arith.constant 54 : i32
      %493 = arith.addi %0, %c54_i32_148 : i32
      %c15_i32_149 = arith.constant 15 : i32
      %494 = arith.addi %493, %c15_i32_149 : i32
      %495 = arith.index_cast %494 : i32 to index
      %496 = memref.load %arg3[%495] : memref<432xf32, #tpu.memory_space<smem>>
      %497 = vector.broadcast %496 : f32 to vector<8x16xf32>
      %498 = arith.mulf %478, %497 : vector<8x16xf32>
      %499 = arith.addf %466, %498 : vector<8x16xf32>
      %c81_i32_150 = arith.constant 81 : i32
      %500 = arith.addi %0, %c81_i32_150 : i32
      %c15_i32_151 = arith.constant 15 : i32
      %501 = arith.addi %500, %c15_i32_151 : i32
      %502 = arith.index_cast %501 : i32 to index
      %503 = memref.load %arg3[%502] : memref<432xf32, #tpu.memory_space<smem>>
      %504 = vector.broadcast %503 : f32 to vector<8x16xf32>
      %505 = arith.mulf %478, %504 : vector<8x16xf32>
      %506 = arith.addf %473, %505 : vector<8x16xf32>
      %507 = vector.extract_strided_slice %477 {offsets = [0, 1], sizes = [8, 16], strides = [1, 1]} : vector<8x18xf32> to vector<8x16xf32>
      %c0_i32_152 = arith.constant 0 : i32
      %508 = arith.addi %0, %c0_i32_152 : i32
      %c16_i32 = arith.constant 16 : i32
      %509 = arith.addi %508, %c16_i32 : i32
      %510 = arith.index_cast %509 : i32 to index
      %511 = memref.load %arg3[%510] : memref<432xf32, #tpu.memory_space<smem>>
      %512 = vector.broadcast %511 : f32 to vector<8x16xf32>
      %513 = arith.mulf %507, %512 : vector<8x16xf32>
      %514 = arith.addf %485, %513 : vector<8x16xf32>
      %c27_i32_153 = arith.constant 27 : i32
      %515 = arith.addi %0, %c27_i32_153 : i32
      %c16_i32_154 = arith.constant 16 : i32
      %516 = arith.addi %515, %c16_i32_154 : i32
      %517 = arith.index_cast %516 : i32 to index
      %518 = memref.load %arg3[%517] : memref<432xf32, #tpu.memory_space<smem>>
      %519 = vector.broadcast %518 : f32 to vector<8x16xf32>
      %520 = arith.mulf %507, %519 : vector<8x16xf32>
      %521 = arith.addf %492, %520 : vector<8x16xf32>
      %c54_i32_155 = arith.constant 54 : i32
      %522 = arith.addi %0, %c54_i32_155 : i32
      %c16_i32_156 = arith.constant 16 : i32
      %523 = arith.addi %522, %c16_i32_156 : i32
      %524 = arith.index_cast %523 : i32 to index
      %525 = memref.load %arg3[%524] : memref<432xf32, #tpu.memory_space<smem>>
      %526 = vector.broadcast %525 : f32 to vector<8x16xf32>
      %527 = arith.mulf %507, %526 : vector<8x16xf32>
      %528 = arith.addf %499, %527 : vector<8x16xf32>
      %c81_i32_157 = arith.constant 81 : i32
      %529 = arith.addi %0, %c81_i32_157 : i32
      %c16_i32_158 = arith.constant 16 : i32
      %530 = arith.addi %529, %c16_i32_158 : i32
      %531 = arith.index_cast %530 : i32 to index
      %532 = memref.load %arg3[%531] : memref<432xf32, #tpu.memory_space<smem>>
      %533 = vector.broadcast %532 : f32 to vector<8x16xf32>
      %534 = arith.mulf %507, %533 : vector<8x16xf32>
      %535 = arith.addf %506, %534 : vector<8x16xf32>
      %536 = vector.extract_strided_slice %477 {offsets = [0, 2], sizes = [8, 16], strides = [1, 1]} : vector<8x18xf32> to vector<8x16xf32>
      %c0_i32_159 = arith.constant 0 : i32
      %537 = arith.addi %0, %c0_i32_159 : i32
      %c17_i32 = arith.constant 17 : i32
      %538 = arith.addi %537, %c17_i32 : i32
      %539 = arith.index_cast %538 : i32 to index
      %540 = memref.load %arg3[%539] : memref<432xf32, #tpu.memory_space<smem>>
      %541 = vector.broadcast %540 : f32 to vector<8x16xf32>
      %542 = arith.mulf %536, %541 : vector<8x16xf32>
      %543 = arith.addf %514, %542 : vector<8x16xf32>
      %c27_i32_160 = arith.constant 27 : i32
      %544 = arith.addi %0, %c27_i32_160 : i32
      %c17_i32_161 = arith.constant 17 : i32
      %545 = arith.addi %544, %c17_i32_161 : i32
      %546 = arith.index_cast %545 : i32 to index
      %547 = memref.load %arg3[%546] : memref<432xf32, #tpu.memory_space<smem>>
      %548 = vector.broadcast %547 : f32 to vector<8x16xf32>
      %549 = arith.mulf %536, %548 : vector<8x16xf32>
      %550 = arith.addf %521, %549 : vector<8x16xf32>
      %c54_i32_162 = arith.constant 54 : i32
      %551 = arith.addi %0, %c54_i32_162 : i32
      %c17_i32_163 = arith.constant 17 : i32
      %552 = arith.addi %551, %c17_i32_163 : i32
      %553 = arith.index_cast %552 : i32 to index
      %554 = memref.load %arg3[%553] : memref<432xf32, #tpu.memory_space<smem>>
      %555 = vector.broadcast %554 : f32 to vector<8x16xf32>
      %556 = arith.mulf %536, %555 : vector<8x16xf32>
      %557 = arith.addf %528, %556 : vector<8x16xf32>
      %c81_i32_164 = arith.constant 81 : i32
      %558 = arith.addi %0, %c81_i32_164 : i32
      %c17_i32_165 = arith.constant 17 : i32
      %559 = arith.addi %558, %c17_i32_165 : i32
      %560 = arith.index_cast %559 : i32 to index
      %561 = memref.load %arg3[%560] : memref<432xf32, #tpu.memory_space<smem>>
      %562 = vector.broadcast %561 : f32 to vector<8x16xf32>
      %563 = arith.mulf %536, %562 : vector<8x16xf32>
      %564 = arith.addf %535, %563 : vector<8x16xf32>
      %c0_i32_166 = arith.constant 0 : i32
      %565 = arith.addi %14, %c0_i32_166 : i32
      %c0_167 = arith.constant 0 : index
      %c2 = arith.constant 2 : index
      %566 = arith.index_cast %565 : i32 to index
      %c0_168 = arith.constant 0 : index
      %567 = vector.load %arg2[%c0_167, %c2, %566, %c0_168] : memref<1x3x18x18xf32, #tpu.memory_space<vmem>>, vector<1x1x8x18xf32>
      %568 = vector.shape_cast %567 : vector<1x1x8x18xf32> to vector<8x18xf32>
      %569 = vector.extract_strided_slice %568 {offsets = [0, 0], sizes = [8, 16], strides = [1, 1]} : vector<8x18xf32> to vector<8x16xf32>
      %c0_i32_169 = arith.constant 0 : i32
      %570 = arith.addi %0, %c0_i32_169 : i32
      %c18_i32 = arith.constant 18 : i32
      %571 = arith.addi %570, %c18_i32 : i32
      %572 = arith.index_cast %571 : i32 to index
      %573 = memref.load %arg3[%572] : memref<432xf32, #tpu.memory_space<smem>>
      %574 = vector.broadcast %573 : f32 to vector<8x16xf32>
      %575 = arith.mulf %569, %574 : vector<8x16xf32>
      %576 = arith.addf %543, %575 : vector<8x16xf32>
      %c27_i32_170 = arith.constant 27 : i32
      %577 = arith.addi %0, %c27_i32_170 : i32
      %c18_i32_171 = arith.constant 18 : i32
      %578 = arith.addi %577, %c18_i32_171 : i32
      %579 = arith.index_cast %578 : i32 to index
      %580 = memref.load %arg3[%579] : memref<432xf32, #tpu.memory_space<smem>>
      %581 = vector.broadcast %580 : f32 to vector<8x16xf32>
      %582 = arith.mulf %569, %581 : vector<8x16xf32>
      %583 = arith.addf %550, %582 : vector<8x16xf32>
      %c54_i32_172 = arith.constant 54 : i32
      %584 = arith.addi %0, %c54_i32_172 : i32
      %c18_i32_173 = arith.constant 18 : i32
      %585 = arith.addi %584, %c18_i32_173 : i32
      %586 = arith.index_cast %585 : i32 to index
      %587 = memref.load %arg3[%586] : memref<432xf32, #tpu.memory_space<smem>>
      %588 = vector.broadcast %587 : f32 to vector<8x16xf32>
      %589 = arith.mulf %569, %588 : vector<8x16xf32>
      %590 = arith.addf %557, %589 : vector<8x16xf32>
      %c81_i32_174 = arith.constant 81 : i32
      %591 = arith.addi %0, %c81_i32_174 : i32
      %c18_i32_175 = arith.constant 18 : i32
      %592 = arith.addi %591, %c18_i32_175 : i32
      %593 = arith.index_cast %592 : i32 to index
      %594 = memref.load %arg3[%593] : memref<432xf32, #tpu.memory_space<smem>>
      %595 = vector.broadcast %594 : f32 to vector<8x16xf32>
      %596 = arith.mulf %569, %595 : vector<8x16xf32>
      %597 = arith.addf %564, %596 : vector<8x16xf32>
      %598 = vector.extract_strided_slice %568 {offsets = [0, 1], sizes = [8, 16], strides = [1, 1]} : vector<8x18xf32> to vector<8x16xf32>
      %c0_i32_176 = arith.constant 0 : i32
      %599 = arith.addi %0, %c0_i32_176 : i32
      %c19_i32 = arith.constant 19 : i32
      %600 = arith.addi %599, %c19_i32 : i32
      %601 = arith.index_cast %600 : i32 to index
      %602 = memref.load %arg3[%601] : memref<432xf32, #tpu.memory_space<smem>>
      %603 = vector.broadcast %602 : f32 to vector<8x16xf32>
      %604 = arith.mulf %598, %603 : vector<8x16xf32>
      %605 = arith.addf %576, %604 : vector<8x16xf32>
      %c27_i32_177 = arith.constant 27 : i32
      %606 = arith.addi %0, %c27_i32_177 : i32
      %c19_i32_178 = arith.constant 19 : i32
      %607 = arith.addi %606, %c19_i32_178 : i32
      %608 = arith.index_cast %607 : i32 to index
      %609 = memref.load %arg3[%608] : memref<432xf32, #tpu.memory_space<smem>>
      %610 = vector.broadcast %609 : f32 to vector<8x16xf32>
      %611 = arith.mulf %598, %610 : vector<8x16xf32>
      %612 = arith.addf %583, %611 : vector<8x16xf32>
      %c54_i32_179 = arith.constant 54 : i32
      %613 = arith.addi %0, %c54_i32_179 : i32
      %c19_i32_180 = arith.constant 19 : i32
      %614 = arith.addi %613, %c19_i32_180 : i32
      %615 = arith.index_cast %614 : i32 to index
      %616 = memref.load %arg3[%615] : memref<432xf32, #tpu.memory_space<smem>>
      %617 = vector.broadcast %616 : f32 to vector<8x16xf32>
      %618 = arith.mulf %598, %617 : vector<8x16xf32>
      %619 = arith.addf %590, %618 : vector<8x16xf32>
      %c81_i32_181 = arith.constant 81 : i32
      %620 = arith.addi %0, %c81_i32_181 : i32
      %c19_i32_182 = arith.constant 19 : i32
      %621 = arith.addi %620, %c19_i32_182 : i32
      %622 = arith.index_cast %621 : i32 to index
      %623 = memref.load %arg3[%622] : memref<432xf32, #tpu.memory_space<smem>>
      %624 = vector.broadcast %623 : f32 to vector<8x16xf32>
      %625 = arith.mulf %598, %624 : vector<8x16xf32>
      %626 = arith.addf %597, %625 : vector<8x16xf32>
      %627 = vector.extract_strided_slice %568 {offsets = [0, 2], sizes = [8, 16], strides = [1, 1]} : vector<8x18xf32> to vector<8x16xf32>
      %c0_i32_183 = arith.constant 0 : i32
      %628 = arith.addi %0, %c0_i32_183 : i32
      %c20_i32 = arith.constant 20 : i32
      %629 = arith.addi %628, %c20_i32 : i32
      %630 = arith.index_cast %629 : i32 to index
      %631 = memref.load %arg3[%630] : memref<432xf32, #tpu.memory_space<smem>>
      %632 = vector.broadcast %631 : f32 to vector<8x16xf32>
      %633 = arith.mulf %627, %632 : vector<8x16xf32>
      %634 = arith.addf %605, %633 : vector<8x16xf32>
      %c27_i32_184 = arith.constant 27 : i32
      %635 = arith.addi %0, %c27_i32_184 : i32
      %c20_i32_185 = arith.constant 20 : i32
      %636 = arith.addi %635, %c20_i32_185 : i32
      %637 = arith.index_cast %636 : i32 to index
      %638 = memref.load %arg3[%637] : memref<432xf32, #tpu.memory_space<smem>>
      %639 = vector.broadcast %638 : f32 to vector<8x16xf32>
      %640 = arith.mulf %627, %639 : vector<8x16xf32>
      %641 = arith.addf %612, %640 : vector<8x16xf32>
      %c54_i32_186 = arith.constant 54 : i32
      %642 = arith.addi %0, %c54_i32_186 : i32
      %c20_i32_187 = arith.constant 20 : i32
      %643 = arith.addi %642, %c20_i32_187 : i32
      %644 = arith.index_cast %643 : i32 to index
      %645 = memref.load %arg3[%644] : memref<432xf32, #tpu.memory_space<smem>>
      %646 = vector.broadcast %645 : f32 to vector<8x16xf32>
      %647 = arith.mulf %627, %646 : vector<8x16xf32>
      %648 = arith.addf %619, %647 : vector<8x16xf32>
      %c81_i32_188 = arith.constant 81 : i32
      %649 = arith.addi %0, %c81_i32_188 : i32
      %c20_i32_189 = arith.constant 20 : i32
      %650 = arith.addi %649, %c20_i32_189 : i32
      %651 = arith.index_cast %650 : i32 to index
      %652 = memref.load %arg3[%651] : memref<432xf32, #tpu.memory_space<smem>>
      %653 = vector.broadcast %652 : f32 to vector<8x16xf32>
      %654 = arith.mulf %627, %653 : vector<8x16xf32>
      %655 = arith.addf %626, %654 : vector<8x16xf32>
      %c1_i32_190 = arith.constant 1 : i32
      %656 = arith.addi %14, %c1_i32_190 : i32
      %c0_191 = arith.constant 0 : index
      %c2_192 = arith.constant 2 : index
      %657 = arith.index_cast %656 : i32 to index
      %c0_193 = arith.constant 0 : index
      %658 = vector.load %arg2[%c0_191, %c2_192, %657, %c0_193] : memref<1x3x18x18xf32, #tpu.memory_space<vmem>>, vector<1x1x8x18xf32>
      %659 = vector.shape_cast %658 : vector<1x1x8x18xf32> to vector<8x18xf32>
      %660 = vector.extract_strided_slice %659 {offsets = [0, 0], sizes = [8, 16], strides = [1, 1]} : vector<8x18xf32> to vector<8x16xf32>
      %c0_i32_194 = arith.constant 0 : i32
      %661 = arith.addi %0, %c0_i32_194 : i32
      %c21_i32 = arith.constant 21 : i32
      %662 = arith.addi %661, %c21_i32 : i32
      %663 = arith.index_cast %662 : i32 to index
      %664 = memref.load %arg3[%663] : memref<432xf32, #tpu.memory_space<smem>>
      %665 = vector.broadcast %664 : f32 to vector<8x16xf32>
      %666 = arith.mulf %660, %665 : vector<8x16xf32>
      %667 = arith.addf %634, %666 : vector<8x16xf32>
      %c27_i32_195 = arith.constant 27 : i32
      %668 = arith.addi %0, %c27_i32_195 : i32
      %c21_i32_196 = arith.constant 21 : i32
      %669 = arith.addi %668, %c21_i32_196 : i32
      %670 = arith.index_cast %669 : i32 to index
      %671 = memref.load %arg3[%670] : memref<432xf32, #tpu.memory_space<smem>>
      %672 = vector.broadcast %671 : f32 to vector<8x16xf32>
      %673 = arith.mulf %660, %672 : vector<8x16xf32>
      %674 = arith.addf %641, %673 : vector<8x16xf32>
      %c54_i32_197 = arith.constant 54 : i32
      %675 = arith.addi %0, %c54_i32_197 : i32
      %c21_i32_198 = arith.constant 21 : i32
      %676 = arith.addi %675, %c21_i32_198 : i32
      %677 = arith.index_cast %676 : i32 to index
      %678 = memref.load %arg3[%677] : memref<432xf32, #tpu.memory_space<smem>>
      %679 = vector.broadcast %678 : f32 to vector<8x16xf32>
      %680 = arith.mulf %660, %679 : vector<8x16xf32>
      %681 = arith.addf %648, %680 : vector<8x16xf32>
      %c81_i32_199 = arith.constant 81 : i32
      %682 = arith.addi %0, %c81_i32_199 : i32
      %c21_i32_200 = arith.constant 21 : i32
      %683 = arith.addi %682, %c21_i32_200 : i32
      %684 = arith.index_cast %683 : i32 to index
      %685 = memref.load %arg3[%684] : memref<432xf32, #tpu.memory_space<smem>>
      %686 = vector.broadcast %685 : f32 to vector<8x16xf32>
      %687 = arith.mulf %660, %686 : vector<8x16xf32>
      %688 = arith.addf %655, %687 : vector<8x16xf32>
      %689 = vector.extract_strided_slice %659 {offsets = [0, 1], sizes = [8, 16], strides = [1, 1]} : vector<8x18xf32> to vector<8x16xf32>
      %c0_i32_201 = arith.constant 0 : i32
      %690 = arith.addi %0, %c0_i32_201 : i32
      %c22_i32 = arith.constant 22 : i32
      %691 = arith.addi %690, %c22_i32 : i32
      %692 = arith.index_cast %691 : i32 to index
      %693 = memref.load %arg3[%692] : memref<432xf32, #tpu.memory_space<smem>>
      %694 = vector.broadcast %693 : f32 to vector<8x16xf32>
      %695 = arith.mulf %689, %694 : vector<8x16xf32>
      %696 = arith.addf %667, %695 : vector<8x16xf32>
      %c27_i32_202 = arith.constant 27 : i32
      %697 = arith.addi %0, %c27_i32_202 : i32
      %c22_i32_203 = arith.constant 22 : i32
      %698 = arith.addi %697, %c22_i32_203 : i32
      %699 = arith.index_cast %698 : i32 to index
      %700 = memref.load %arg3[%699] : memref<432xf32, #tpu.memory_space<smem>>
      %701 = vector.broadcast %700 : f32 to vector<8x16xf32>
      %702 = arith.mulf %689, %701 : vector<8x16xf32>
      %703 = arith.addf %674, %702 : vector<8x16xf32>
      %c54_i32_204 = arith.constant 54 : i32
      %704 = arith.addi %0, %c54_i32_204 : i32
      %c22_i32_205 = arith.constant 22 : i32
      %705 = arith.addi %704, %c22_i32_205 : i32
      %706 = arith.index_cast %705 : i32 to index
      %707 = memref.load %arg3[%706] : memref<432xf32, #tpu.memory_space<smem>>
      %708 = vector.broadcast %707 : f32 to vector<8x16xf32>
      %709 = arith.mulf %689, %708 : vector<8x16xf32>
      %710 = arith.addf %681, %709 : vector<8x16xf32>
      %c81_i32_206 = arith.constant 81 : i32
      %711 = arith.addi %0, %c81_i32_206 : i32
      %c22_i32_207 = arith.constant 22 : i32
      %712 = arith.addi %711, %c22_i32_207 : i32
      %713 = arith.index_cast %712 : i32 to index
      %714 = memref.load %arg3[%713] : memref<432xf32, #tpu.memory_space<smem>>
      %715 = vector.broadcast %714 : f32 to vector<8x16xf32>
      %716 = arith.mulf %689, %715 : vector<8x16xf32>
      %717 = arith.addf %688, %716 : vector<8x16xf32>
      %718 = vector.extract_strided_slice %659 {offsets = [0, 2], sizes = [8, 16], strides = [1, 1]} : vector<8x18xf32> to vector<8x16xf32>
      %c0_i32_208 = arith.constant 0 : i32
      %719 = arith.addi %0, %c0_i32_208 : i32
      %c23_i32 = arith.constant 23 : i32
      %720 = arith.addi %719, %c23_i32 : i32
      %721 = arith.index_cast %720 : i32 to index
      %722 = memref.load %arg3[%721] : memref<432xf32, #tpu.memory_space<smem>>
      %723 = vector.broadcast %722 : f32 to vector<8x16xf32>
      %724 = arith.mulf %718, %723 : vector<8x16xf32>
      %725 = arith.addf %696, %724 : vector<8x16xf32>
      %c27_i32_209 = arith.constant 27 : i32
      %726 = arith.addi %0, %c27_i32_209 : i32
      %c23_i32_210 = arith.constant 23 : i32
      %727 = arith.addi %726, %c23_i32_210 : i32
      %728 = arith.index_cast %727 : i32 to index
      %729 = memref.load %arg3[%728] : memref<432xf32, #tpu.memory_space<smem>>
      %730 = vector.broadcast %729 : f32 to vector<8x16xf32>
      %731 = arith.mulf %718, %730 : vector<8x16xf32>
      %732 = arith.addf %703, %731 : vector<8x16xf32>
      %c54_i32_211 = arith.constant 54 : i32
      %733 = arith.addi %0, %c54_i32_211 : i32
      %c23_i32_212 = arith.constant 23 : i32
      %734 = arith.addi %733, %c23_i32_212 : i32
      %735 = arith.index_cast %734 : i32 to index
      %736 = memref.load %arg3[%735] : memref<432xf32, #tpu.memory_space<smem>>
      %737 = vector.broadcast %736 : f32 to vector<8x16xf32>
      %738 = arith.mulf %718, %737 : vector<8x16xf32>
      %739 = arith.addf %710, %738 : vector<8x16xf32>
      %c81_i32_213 = arith.constant 81 : i32
      %740 = arith.addi %0, %c81_i32_213 : i32
      %c23_i32_214 = arith.constant 23 : i32
      %741 = arith.addi %740, %c23_i32_214 : i32
      %742 = arith.index_cast %741 : i32 to index
      %743 = memref.load %arg3[%742] : memref<432xf32, #tpu.memory_space<smem>>
      %744 = vector.broadcast %743 : f32 to vector<8x16xf32>
      %745 = arith.mulf %718, %744 : vector<8x16xf32>
      %746 = arith.addf %717, %745 : vector<8x16xf32>
      %c2_i32_215 = arith.constant 2 : i32
      %747 = arith.addi %14, %c2_i32_215 : i32
      %c0_216 = arith.constant 0 : index
      %c2_217 = arith.constant 2 : index
      %748 = arith.index_cast %747 : i32 to index
      %c0_218 = arith.constant 0 : index
      %749 = vector.load %arg2[%c0_216, %c2_217, %748, %c0_218] : memref<1x3x18x18xf32, #tpu.memory_space<vmem>>, vector<1x1x8x18xf32>
      %750 = vector.shape_cast %749 : vector<1x1x8x18xf32> to vector<8x18xf32>
      %751 = vector.extract_strided_slice %750 {offsets = [0, 0], sizes = [8, 16], strides = [1, 1]} : vector<8x18xf32> to vector<8x16xf32>
      %c0_i32_219 = arith.constant 0 : i32
      %752 = arith.addi %0, %c0_i32_219 : i32
      %c24_i32 = arith.constant 24 : i32
      %753 = arith.addi %752, %c24_i32 : i32
      %754 = arith.index_cast %753 : i32 to index
      %755 = memref.load %arg3[%754] : memref<432xf32, #tpu.memory_space<smem>>
      %756 = vector.broadcast %755 : f32 to vector<8x16xf32>
      %757 = arith.mulf %751, %756 : vector<8x16xf32>
      %758 = arith.addf %725, %757 : vector<8x16xf32>
      %c27_i32_220 = arith.constant 27 : i32
      %759 = arith.addi %0, %c27_i32_220 : i32
      %c24_i32_221 = arith.constant 24 : i32
      %760 = arith.addi %759, %c24_i32_221 : i32
      %761 = arith.index_cast %760 : i32 to index
      %762 = memref.load %arg3[%761] : memref<432xf32, #tpu.memory_space<smem>>
      %763 = vector.broadcast %762 : f32 to vector<8x16xf32>
      %764 = arith.mulf %751, %763 : vector<8x16xf32>
      %765 = arith.addf %732, %764 : vector<8x16xf32>
      %c54_i32_222 = arith.constant 54 : i32
      %766 = arith.addi %0, %c54_i32_222 : i32
      %c24_i32_223 = arith.constant 24 : i32
      %767 = arith.addi %766, %c24_i32_223 : i32
      %768 = arith.index_cast %767 : i32 to index
      %769 = memref.load %arg3[%768] : memref<432xf32, #tpu.memory_space<smem>>
      %770 = vector.broadcast %769 : f32 to vector<8x16xf32>
      %771 = arith.mulf %751, %770 : vector<8x16xf32>
      %772 = arith.addf %739, %771 : vector<8x16xf32>
      %c81_i32_224 = arith.constant 81 : i32
      %773 = arith.addi %0, %c81_i32_224 : i32
      %c24_i32_225 = arith.constant 24 : i32
      %774 = arith.addi %773, %c24_i32_225 : i32
      %775 = arith.index_cast %774 : i32 to index
      %776 = memref.load %arg3[%775] : memref<432xf32, #tpu.memory_space<smem>>
      %777 = vector.broadcast %776 : f32 to vector<8x16xf32>
      %778 = arith.mulf %751, %777 : vector<8x16xf32>
      %779 = arith.addf %746, %778 : vector<8x16xf32>
      %780 = vector.extract_strided_slice %750 {offsets = [0, 1], sizes = [8, 16], strides = [1, 1]} : vector<8x18xf32> to vector<8x16xf32>
      %c0_i32_226 = arith.constant 0 : i32
      %781 = arith.addi %0, %c0_i32_226 : i32
      %c25_i32 = arith.constant 25 : i32
      %782 = arith.addi %781, %c25_i32 : i32
      %783 = arith.index_cast %782 : i32 to index
      %784 = memref.load %arg3[%783] : memref<432xf32, #tpu.memory_space<smem>>
      %785 = vector.broadcast %784 : f32 to vector<8x16xf32>
      %786 = arith.mulf %780, %785 : vector<8x16xf32>
      %787 = arith.addf %758, %786 : vector<8x16xf32>
      %c27_i32_227 = arith.constant 27 : i32
      %788 = arith.addi %0, %c27_i32_227 : i32
      %c25_i32_228 = arith.constant 25 : i32
      %789 = arith.addi %788, %c25_i32_228 : i32
      %790 = arith.index_cast %789 : i32 to index
      %791 = memref.load %arg3[%790] : memref<432xf32, #tpu.memory_space<smem>>
      %792 = vector.broadcast %791 : f32 to vector<8x16xf32>
      %793 = arith.mulf %780, %792 : vector<8x16xf32>
      %794 = arith.addf %765, %793 : vector<8x16xf32>
      %c54_i32_229 = arith.constant 54 : i32
      %795 = arith.addi %0, %c54_i32_229 : i32
      %c25_i32_230 = arith.constant 25 : i32
      %796 = arith.addi %795, %c25_i32_230 : i32
      %797 = arith.index_cast %796 : i32 to index
      %798 = memref.load %arg3[%797] : memref<432xf32, #tpu.memory_space<smem>>
      %799 = vector.broadcast %798 : f32 to vector<8x16xf32>
      %800 = arith.mulf %780, %799 : vector<8x16xf32>
      %801 = arith.addf %772, %800 : vector<8x16xf32>
      %c81_i32_231 = arith.constant 81 : i32
      %802 = arith.addi %0, %c81_i32_231 : i32
      %c25_i32_232 = arith.constant 25 : i32
      %803 = arith.addi %802, %c25_i32_232 : i32
      %804 = arith.index_cast %803 : i32 to index
      %805 = memref.load %arg3[%804] : memref<432xf32, #tpu.memory_space<smem>>
      %806 = vector.broadcast %805 : f32 to vector<8x16xf32>
      %807 = arith.mulf %780, %806 : vector<8x16xf32>
      %808 = arith.addf %779, %807 : vector<8x16xf32>
      %809 = vector.extract_strided_slice %750 {offsets = [0, 2], sizes = [8, 16], strides = [1, 1]} : vector<8x18xf32> to vector<8x16xf32>
      %c0_i32_233 = arith.constant 0 : i32
      %810 = arith.addi %0, %c0_i32_233 : i32
      %c26_i32 = arith.constant 26 : i32
      %811 = arith.addi %810, %c26_i32 : i32
      %812 = arith.index_cast %811 : i32 to index
      %813 = memref.load %arg3[%812] : memref<432xf32, #tpu.memory_space<smem>>
      %814 = vector.broadcast %813 : f32 to vector<8x16xf32>
      %815 = arith.mulf %809, %814 : vector<8x16xf32>
      %816 = arith.addf %787, %815 : vector<8x16xf32>
      %c27_i32_234 = arith.constant 27 : i32
      %817 = arith.addi %0, %c27_i32_234 : i32
      %c26_i32_235 = arith.constant 26 : i32
      %818 = arith.addi %817, %c26_i32_235 : i32
      %819 = arith.index_cast %818 : i32 to index
      %820 = memref.load %arg3[%819] : memref<432xf32, #tpu.memory_space<smem>>
      %821 = vector.broadcast %820 : f32 to vector<8x16xf32>
      %822 = arith.mulf %809, %821 : vector<8x16xf32>
      %823 = arith.addf %794, %822 : vector<8x16xf32>
      %c54_i32_236 = arith.constant 54 : i32
      %824 = arith.addi %0, %c54_i32_236 : i32
      %c26_i32_237 = arith.constant 26 : i32
      %825 = arith.addi %824, %c26_i32_237 : i32
      %826 = arith.index_cast %825 : i32 to index
      %827 = memref.load %arg3[%826] : memref<432xf32, #tpu.memory_space<smem>>
      %828 = vector.broadcast %827 : f32 to vector<8x16xf32>
      %829 = arith.mulf %809, %828 : vector<8x16xf32>
      %830 = arith.addf %801, %829 : vector<8x16xf32>
      %c81_i32_238 = arith.constant 81 : i32
      %831 = arith.addi %0, %c81_i32_238 : i32
      %c26_i32_239 = arith.constant 26 : i32
      %832 = arith.addi %831, %c26_i32_239 : i32
      %833 = arith.index_cast %832 : i32 to index
      %834 = memref.load %arg3[%833] : memref<432xf32, #tpu.memory_space<smem>>
      %835 = vector.broadcast %834 : f32 to vector<8x16xf32>
      %836 = arith.mulf %809, %835 : vector<8x16xf32>
      %837 = arith.addf %808, %836 : vector<8x16xf32>
      %c0_i32_240 = arith.constant 0 : i32
      %838 = arith.addi %1, %c0_i32_240 : i32
      %839 = arith.index_cast %838 : i32 to index
      %840 = memref.load %arg4[%839] : memref<16xf32, #tpu.memory_space<smem>>
      %841 = vector.broadcast %840 : f32 to vector<8x16xf32>
      %842 = arith.addf %816, %841 : vector<8x16xf32>
      %cst_241 = arith.constant 0.000000e+00 : f32
      %843 = vector.broadcast %cst_241 : f32 to vector<8x16xf32>
      %844 = arith.maximumf %842, %843 : vector<8x16xf32>
      %c0_i32_242 = arith.constant 0 : i32
      %845 = arith.addi %c0_i32_242, %14 : i32
      %846 = arith.index_cast %845 : i32 to index
      %c0_243 = arith.constant 0 : index
      %847 = vector.load %arg8[%846, %c0_243] : memref<64x16xf32, #tpu.memory_space<vmem>>, vector<8x16xf32>
      tpu.vector_store %arg8[%846, %c0_243], %844 {strides = array<i32>} : memref<64x16xf32, #tpu.memory_space<vmem>>, vector<8x16xf32>,
      %c1_i32_244 = arith.constant 1 : i32
      %848 = arith.addi %1, %c1_i32_244 : i32
      %849 = arith.index_cast %848 : i32 to index
      %850 = memref.load %arg4[%849] : memref<16xf32, #tpu.memory_space<smem>>
      %851 = vector.broadcast %850 : f32 to vector<8x16xf32>
      %852 = arith.addf %823, %851 : vector<8x16xf32>
      %cst_245 = arith.constant 0.000000e+00 : f32
      %853 = vector.broadcast %cst_245 : f32 to vector<8x16xf32>
      %854 = arith.maximumf %852, %853 : vector<8x16xf32>
      %c16_i32_246 = arith.constant 16 : i32
      %855 = arith.addi %c16_i32_246, %14 : i32
      %856 = arith.index_cast %855 : i32 to index
      %c0_247 = arith.constant 0 : index
      %857 = vector.load %arg8[%856, %c0_247] : memref<64x16xf32, #tpu.memory_space<vmem>>, vector<8x16xf32>
      tpu.vector_store %arg8[%856, %c0_247], %854 {strides = array<i32>} : memref<64x16xf32, #tpu.memory_space<vmem>>, vector<8x16xf32>,
      %c2_i32_248 = arith.constant 2 : i32
      %858 = arith.addi %1, %c2_i32_248 : i32
      %859 = arith.index_cast %858 : i32 to index
      %860 = memref.load %arg4[%859] : memref<16xf32, #tpu.memory_space<smem>>
      %861 = vector.broadcast %860 : f32 to vector<8x16xf32>
      %862 = arith.addf %830, %861 : vector<8x16xf32>
      %cst_249 = arith.constant 0.000000e+00 : f32
      %863 = vector.broadcast %cst_249 : f32 to vector<8x16xf32>
      %864 = arith.maximumf %862, %863 : vector<8x16xf32>
      %c32_i32 = arith.constant 32 : i32
      %865 = arith.addi %c32_i32, %14 : i32
      %866 = arith.index_cast %865 : i32 to index
      %c0_250 = arith.constant 0 : index
      %867 = vector.load %arg8[%866, %c0_250] : memref<64x16xf32, #tpu.memory_space<vmem>>, vector<8x16xf32>
      tpu.vector_store %arg8[%866, %c0_250], %864 {strides = array<i32>} : memref<64x16xf32, #tpu.memory_space<vmem>>, vector<8x16xf32>,
      %c3_i32_251 = arith.constant 3 : i32
      %868 = arith.addi %1, %c3_i32_251 : i32
      %869 = arith.index_cast %868 : i32 to index
      %870 = memref.load %arg4[%869] : memref<16xf32, #tpu.memory_space<smem>>
      %871 = vector.broadcast %870 : f32 to vector<8x16xf32>
      %872 = arith.addf %837, %871 : vector<8x16xf32>
      %cst_252 = arith.constant 0.000000e+00 : f32
      %873 = vector.broadcast %cst_252 : f32 to vector<8x16xf32>
      %874 = arith.maximumf %872, %873 : vector<8x16xf32>
      %c48_i32 = arith.constant 48 : i32
      %875 = arith.addi %c48_i32, %14 : i32
      %876 = arith.index_cast %875 : i32 to index
      %c0_253 = arith.constant 0 : index
      %877 = vector.load %arg8[%876, %c0_253] : memref<64x16xf32, #tpu.memory_space<vmem>>, vector<8x16xf32>
      tpu.vector_store %arg8[%876, %c0_253], %874 {strides = array<i32>} : memref<64x16xf32, #tpu.memory_space<vmem>>, vector<8x16xf32>,
    }
    %c2_i32_0 = arith.constant 2 : i32
    %c0 = arith.constant 0 : index
    %c0_1 = arith.constant 0 : index
    %3 = vector.load %arg8[%c0, %c0_1] : memref<64x16xf32, #tpu.memory_space<vmem>>, vector<64x16xf32>
    %4 = arith.truncf %3 : vector<64x16xf32> to vector<64x16xbf16>
    %c0_2 = arith.constant 0 : index
    %c0_3 = arith.constant 0 : index
    %5 = vector.load %arg5[%c0_2, %c0_3] : memref<16x4xbf16, #tpu.memory_space<vmem>>, vector<16x4xbf16>
    %cst = arith.constant dense<0.000000e+00> : vector<64x4xf32>
    %6 = tpu.matmul %4, %5, %cst {dimension_numbers = #tpu.dot_dimension_numbers<[1], [0], [0], [1], [0, 0, 1, 1], [], []>} : vector<64x16xbf16>, vector<16x4xbf16>, vector<64x4xf32> -> vector<64x4xf32>
    %c0_4 = arith.constant 0 : index
    %c0_5 = arith.constant 0 : index
    %7 = vector.load %arg6[%c0_4, %c0_5] : memref<16x64xbf16, #tpu.memory_space<vmem>>, vector<16x64xbf16>
    %8 = arith.truncf %6 : vector<64x4xf32> to vector<64x4xbf16>
    %cst_6 = arith.constant dense<0.000000e+00> : vector<16x4xf32>
    %9 = tpu.matmul %7, %8, %cst_6 {dimension_numbers = #tpu.dot_dimension_numbers<[1], [0], [0], [1], [0, 0, 1, 1], [], []>} : vector<16x64xbf16>, vector<64x4xbf16>, vector<16x4xf32> -> vector<16x4xf32>
    %c0_7 = arith.constant 0 : index
    %c0_8 = arith.constant 0 : index
    %c0_9 = arith.constant 0 : index
    %10 = vector.load %arg7[%c0_7, %c0_8, %c0_9] : memref<1x16x4xf32, #tpu.memory_space<vmem>>, vector<1x16x4xf32>
    %11 = vector.shape_cast %10 : vector<1x16x4xf32> to vector<16x4xf32>
    %12 = vector.shape_cast %9 : vector<16x4xf32> to vector<1x16x4xf32>
    tpu.vector_store %arg7[%c0_7, %c0_8, %c0_9], %12 {strides = array<i32>} : memref<1x16x4xf32, #tpu.memory_space<vmem>>, vector<1x16x4xf32>,
    return
  }
  func.func @transform_0(%arg0: i32, %arg1: i32) -> (i32, i32, i32, i32) {
    %c0_i32 = arith.constant 0 : i32
    %c0_i32_0 = arith.constant 0 : i32
    %c0_i32_1 = arith.constant 0 : i32
    %c0_i32_2 = arith.constant 0 : i32
    return %arg0, %c0_i32, %c0_i32_0, %c0_i32_1 : i32, i32, i32, i32
  }
  func.func @transform_1(%arg0: i32, %arg1: i32) -> i32 {
    %c0_i32 = arith.constant 0 : i32
    %c0_i32_0 = arith.constant 0 : i32
    return %c0_i32 : i32
  }
  func.func @transform_2(%arg0: i32, %arg1: i32) -> i32 {
    %c0_i32 = arith.constant 0 : i32
    %c0_i32_0 = arith.constant 0 : i32
    return %c0_i32 : i32
  }
  func.func @transform_3(%arg0: i32, %arg1: i32) -> (i32, i32) {
    %c0_i32 = arith.constant 0 : i32
    %c0_i32_0 = arith.constant 0 : i32
    %c0_i32_1 = arith.constant 0 : i32
    return %c0_i32, %c0_i32_0 : i32, i32
  }
  func.func @transform_4(%arg0: i32, %arg1: i32) -> (i32, i32) {
    %c0_i32 = arith.constant 0 : i32
    %c0_i32_0 = arith.constant 0 : i32
    %c0_i32_1 = arith.constant 0 : i32
    return %c0_i32, %c0_i32_0 : i32, i32
  }
  func.func @transform_5(%arg0: i32, %arg1: i32) -> (i32, i32, i32) {
    %c0_i32 = arith.constant 0 : i32
    %c0_i32_0 = arith.constant 0 : i32
    return %arg0, %arg1, %c0_i32 : i32, i32, i32
  }
}

</mosaic_0001>

<bundles_post_ra>
// kernel: tpu_custom_call.1
= control target key start
LH: loop header
LB: loop body
LE: loop exit
PB: predicated region body
PF: predicated region fallthrough
CT: control target
= control target key end

     0   :  { %s2312_s0 = inlined_call_operand.vmem [shape: f32[2,3,18,18], index: 0, kind: input, shape index: {}]   ;;  %s2313_s1 = inlined_call_operand.vmem [shape: f32[432], index: 1, kind: input, shape index: {}]   ;;  %s2314_s2 = inlined_call_operand.vmem [shape: f32[16], index: 2, kind: input, shape index: {}]   ;;  %s2315_s3 = inlined_call_operand.vmem [shape: bf16[16,4], index: 3, kind: input, shape index: {}]   ;;  %s2316_s4 = inlined_call_operand.vmem [shape: bf16[16,64], index: 4, kind: input, shape index: {}]   ;;  %s2317_s5 = inlined_call_operand.vmem [shape: f32[2,64,4], index: 5, kind: output, shape index: {}]  }
   0x1   :  { %2322 = sst [smem:[#allocation9_spill]] %s2312_s0 }
   0x2   :  { %2323 = sst [smem:[#allocation10_spill]] %s2313_s1 }
   0x3   :  { %10 = vsyncpa [#allocation4], 0 }
   0x4   :  { %11 = vsyncpa [#allocation6], 0  ;;  %s1636_s18 = smov 0   ;;  %s1638_s19 = smov 0  }
   0x5   :  { %s1640_s20 = smov 0   ;;  %s1642_s21 = smov 0  }
   0x6   :  { %s1644_s22 = smov 0  }
   0x7 LB: > { %s1399_s23 = sadd.s32 4294967295, %s1596_s22   ;;  %s26_s24 = sadd.s32 1, %s1588_s20  ;;  %s1596_s22 = sphi %s1644_s22, %s17_s22   ;;  %s1592_s21 = sphi %s1642_s21, %s2333_s21   ;;  %s1588_s20 = sphi %s1640_s20, %s2332_s20   ;;  %s1584_s19 = sphi %s1638_s19, %s2331_s19   ;;  %s1580_s18 = sphi %s1636_s18, %s2330_s18  }
   0x8   : > { %p27_p0 = scmp.ge.s32.totalorder %s26_s24, 4  ;;  %s29_s25 = sadd.s32 1, %s1592_s21 }
   0x9   : > { %p1401_p1 = scmp.ge.s32.totalorder %s1596_s22, 1  ;;  %p172_p2 = scmp.lt.s32.totalorder %s1596_s22, 9 }
   0xa   : > { %s2335_s24 = smov (%p27_p0, %s26_s24), 0  ;;  %s2337_s25 = smov (!%p27_p0, %s29_s25), %s1592_s21 }
   0xb   : > { %p1669_p3 = pnand %p1401_p1, %p172_p2  ;;  %p31_p4 = scmp.ge.s32.totalorder %s2337_s25, 2 }
   0xc   : > { %p1673_p5 = scmp.eq.s32.totalorder %s1399_s23, 0  ;;  %s2326_s1 = sld [smem:[#allocation10_spill]] }
   0xd   : > { %p1453_p6 = pneg %p1669_p3  ;;  %s2339_s25 = smov (%p31_p4, %s2337_s25), 0 }
   0xe   : > { %s194_s8 = sshll.u32 %s2314_s2, 4  ;;  %s1602_s9 = smov [#allocation3]   ;;  %s195_s8 = int_to_ptr.vmem [resolvable:$true] %s194_s8 }
   0xf   : > { %p1454_p7 = pnand %p1673_p5, %p1453_p6  ;;  %s1603_s10 = smov [#allocation5]  }
  0x10   : > { %221 = sbr.rel (%p1669_p3) target bundleno = 668 (0x29c), region = 40 }
  0x11   : > { %1459 = dma.vmem_to_smem (!%p1454_p7), %s195_s8, 16, %s1603_s10, [#allocation6]  }
  0x12   : > { %s184_s30 = sshll.u32 %s2326_s1, 4  ;;  %s185_s30 = int_to_ptr.vmem [resolvable:$true] %s184_s30 }
  0x13   : > { %1456 = dma.vmem_to_smem (!%p1454_p7), %s185_s30, 64, %s1602_s9, [#allocation4]  }
  0x15   : > { %1571 = dma.done.wait (%p1673_p5), [#allocation4], 64  }
  0x16   : > { %1573 = vsyncadd (%p1673_p5), [#allocation4], 4294967232 }
  0x17   : > { %1575 = dma.done.wait (%p1673_p5), [#allocation6], 16  }
  0x18   : > { %1577 = vsyncadd (%p1673_p5), [#allocation6], 4294967280 }
  0x19   : > { %233 = sfence }
  0x1a   : > { %p260_p8 = scmp.lt.s32.totalorder %s1584_s19, 1  ;;  %s1409_s11 = sshll.u32 %s1580_s18, 1 }
  0x1b   : > { %p268_p9 = scmp.lt.s32.totalorder %s1409_s11, 7  ;;  %s1702_s12 = smul.u32 108, %s1580_s18 }
  0x1c   : > { %s2341_s19 = smov (!%p260_p8, %s1584_s19), 1  ;;  %s1706_s16 = sshll.u32 %s1580_s18, 2 }
  0x1d   : > { %s2343_s11 = smov (!%p268_p9, %s1409_s11), 7  ;;  %s1444_s13 = smul.u32 72, %s2341_s19 }
  0x1e   : > { %s1410_s14 = sshll.u32 %s2341_s19, 3  ;;  %s2327_s0 = sld [smem:[#allocation9_spill]] }
  0x1f   : > { %s271_s15 = sadd.s32 %s1410_s14, %s2343_s11  ;;  %s1718_s6 = smov 0  }
  0x20   : > { %s1411_s27 = sshll.u32 %s271_s15, 3 }
  0x21   : > { %s1716_s30 = scalar_lea.vmem %s2317_s5, %s1411_s27 }
  0x24   : > { %s1711_s26 = scalar_lea.vmem %s2327_s0, %s1444_s13 }
  0x25 LB: >> { %s326_s18 = sadd.s32 55, %s1702_s12  ;;  %s1413_s19 = sshll.u32 %s1600_s6, 3  ;;  %vm1145_vm0 = vcmask 130048   ;;  %s1600_s6 = sphi %s1718_s6, %s283_s6  }
  0x26   : >> { %s327_s7 = sld [smem:[#allocation3 + %s326_s18]]  ;;  %p285_p10 = scmp.lt.s32.totalorder %s1413_s19, 8 }
  0x27   : >> { %s308_s8 = sadd.s32 1, %s1702_s12  ;;  %s335_s10 = sadd.s32 82, %s1702_s12 }
  0x28   : >> { %s309_s9 = sld [smem:[#allocation3 + %s308_s8]]  ;;  %s2345_s19 = smov (!%p285_p10, %s1413_s19), 8 }
  0x29   : >> { %s336_s11 = sld [smem:[#allocation3 + %s335_s10]]  ;;  %s317_s13 = sadd.s32 28, %s1702_s12 }
  0x2a   : >> { %s1732_s14 = scalar_lea.vmem %s1711_s26, %s2345_s19  ;;  %s318_s15 = sld [smem:[#allocation3 + %s317_s13]] }
  0x2b   : >> { %v1735_v0 = vld [vmem:[%s1732_s14] sm:$0xff]  ;;  %s344_s17 = sadd.s32 2, %s1702_s12  ;;  %s371_s27 = sadd.s32 83, %s1702_s12  ;;  %v1814_v50 = vld [vmem:[%s1732_s14 + $0x18] sm:$0xff] }
  0x2c   : >> { %v328_v1 = vstv %s327_s7  ;;  %s345_s23 = sld [smem:[#allocation3 + %s344_s17]]  ;;  %s2318_s29 = smov 127   ;;  %v1763_v18 = vld [vmem:[%s1732_s14 + $0x1] sm:$0xff] }
  0x2d   : >> { %v329_v2 = vmul.f32 %v328_v1, %v1735_v0  ;;  %s372_s28 = sld [smem:[#allocation3 + %s371_s27]]  ;;  %s362_s18 = sadd.s32 56, %s1702_s12  ;;  %v1784_v31 = vld [vmem:[%s1732_s14 + $0x2] sm:$0xff] }
  0x2e   : >> { %v310_v3 = vstv %s309_s9  ;;  %s353_s8 = sadd.s32 29, %s1702_s12  ;;  %s363_s7 = sld [smem:[#allocation3 + %s362_s18]] }
  0x2f   : >> { %331 = vrot.lane.b32.xlu1 %v329_v2, %s2318_s29  ;;  %v311_v4 = vmul.f32 %v310_v3, %v1735_v0  ;;  %v337_v5 = vstv %s336_s11  ;;  %s354_s10 = sld [smem:[#allocation3 + %s353_s8]]  ;;  %s403_s9 = sadd.s32 4, %s1702_s12 }
  0x30   : >> { %v319_v6 = vstv %s318_s15  ;;  %v338_v7 = vmul.f32 %v337_v5, %v1735_v0  ;;  %s421_s13 = sadd.s32 58, %s1702_s12  ;;  %s2320_s17 = smov 126  }
  0x31   : >> { %313 = vrot.lane.b32.xlu0 %v311_v4, %s2318_s29  ;;  %v320_v10 = vmul.f32 %v319_v6, %v1735_v0  ;;  %s412_s11 = sadd.s32 31, %s1702_s12  ;;  %s404_s15 = sld [smem:[#allocation3 + %s403_s9]]  ;;  %v1844_v6 = vld [vmem:[%s1732_s14 + $0x19] sm:$0xff] }
  0x32   : >> { %v346_v8 = vstv %s345_s23  ;;  %s422_s23 = sld [smem:[#allocation3 + %s421_s13]]  ;;  %s430_s18 = sadd.s32 85, %s1702_s12 }
  0x33   : >> { %v347_v9 = vmul.f32 %v346_v8, %v1735_v0  ;;  %v373_v12 = vstv %s372_s28  ;;  %s413_s27 = sld [smem:[#allocation3 + %s412_s11]]  ;;  %s448_s8 = sadd.s32 32, %s1702_s12 }
  0x34   : >> { %v364_v13 = vstv %s363_s7  ;;  %v374_v15 = vmul.f32 %v373_v12, %v1735_v0  ;;  %s439_s28 = sadd.s32 5, %s1702_s12  ;;  %s449_s7 = sld [smem:[#allocation3 + %s448_s8]] }
  0x35   : >> { %349 = vrot.lane.b32.xlu2 %v347_v9, %s2320_s17  ;;  %v355_v11 = vstv %s354_s10  ;;  %v365_v16 = vmul.f32 %v364_v13, %v1735_v0  ;;  %s431_s10 = sld [smem:[#allocation3 + %s430_s18]]  ;;  %s457_s13 = sadd.s32 59, %s1702_s12 }
  0x36   : >> { %v356_v14 = vmul.f32 %v355_v11, %v1735_v0  ;;  %s440_s9 = sld [smem:[#allocation3 + %s439_s28]]  ;;  %s498_s11 = sadd.s32 7, %s1702_s12 }
  0x37   : >> { %340 = vrot.lane.b32.xlu1 %v338_v7, %s2318_s29  ;;  %v405_v17 = vstv %s404_s15  ;;  %s466_s15 = sadd.s32 86, %s1702_s12  ;;  %s507_s8 = sadd.s32 34, %s1702_s12 }
  0x38   : >> { %v423_v19 = vstv %s422_s23  ;;  %v406_v21 = vmul.f32 %v1763_v18, %v405_v17  ;;  %s458_s23 = sld [smem:[#allocation3 + %s457_s13]]  ;;  %s525_s28 = sadd.s32 88, %s1702_s12 }
  0x39   : >> { %322 = vrot.lane.b32.xlu0 %v320_v10, %s2318_s29  ;;  %v414_v20 = vstv %s413_s27  ;;  %v424_v22 = vmul.f32 %v1763_v18, %v423_v19  ;;  %s499_s27 = sld [smem:[#allocation3 + %s498_s11]]  ;;  %s534_s11 = sadd.s32 8, %s1702_s12 }
  0x3a   : >> { %v415_v23 = vmul.f32 %v1763_v18, %v414_v20  ;;  %v450_v25 = vstv %s449_s7  ;;  %s467_s18 = sld [smem:[#allocation3 + %s466_s15]]  ;;  %s552_s15 = sadd.s32 62, %s1702_s12 }
  0x3b   : >> { %v432_v24 = vstv %s431_s10  ;;  %v451_v28 = vmul.f32 %v1763_v18, %v450_v25  ;;  %s516_s10 = sadd.s32 61, %s1702_s12  ;;  %s508_s7 = sld [smem:[#allocation3 + %s507_s8]] }
  0x3c   : >> { %v441_v26 = vstv %s440_s9  ;;  %v433_v27 = vmul.f32 %v1763_v18, %v432_v24  ;;  %s526_s9 = sld [smem:[#allocation3 + %s525_s28]]  ;;  %s561_s28 = sadd.s32 89, %s1702_s12 }
  0x3d   : >> { %358 = vrot.lane.b32.xlu2 %v356_v14, %s2320_s17  ;;  %v442_v29 = vmul.f32 %v1763_v18, %v441_v26  ;;  %s517_s13 = sld [smem:[#allocation3 + %s516_s10]]  ;;  %s602_s10 = sadd.s32 37, %s1702_s12 }
  0x3e   : >> { %v459_v30 = vstv %s458_s23  ;;  %s543_s23 = sadd.s32 35, %s1702_s12  ;;  %s298_s0 = sadd.s32 54, %s1702_s12 }
  0x3f   : >> { %376 = vrot.lane.b32.xlu1 %v374_v15, %s2320_s17  ;;  %v500_v32 = vstv %s499_s27  ;;  %v460_v34 = vmul.f32 %v1763_v18, %v459_v30  ;;  %s535_s27 = sld [smem:[#allocation3 + %s534_s11]]  ;;  %s283_s6 = sadd.s32 1, %s1600_s6  }
  0x40   : >> { %v468_v33 = vstv %s467_s18  ;;  %v501_v35 = vmul.f32 %v1784_v31, %v500_v32  ;;  %s553_s18 = sld [smem:[#allocation3 + %s552_s15]]  ;;  %s611_s15 = sadd.s32 64, %s1702_s12 }
  0x41   : >> { %367 = vrot.lane.b32.xlu0 %v365_v16, %s2320_s17  ;;  %v469_v36 = vmul.f32 %v1763_v18, %v468_v33  ;;  %v509_v37 = vstv %s508_s7  ;;  %s544_s8 = sld [smem:[#allocation3 + %s543_s23]]  ;;  %s593_s7 = sadd.s32 10, %s1702_s12 }
  0x42   : >> { %v527_v38 = vstv %s526_s9  ;;  %v510_v40 = vmul.f32 %v1784_v31, %v509_v37  ;;  %s562_s9 = sld [smem:[#allocation3 + %s561_s28]]  ;;  %s629_s23 = sadd.s32 11, %s1702_s12 }
  0x43   : >> { %v518_v39 = vstv %s517_s13  ;;  %v528_v41 = vmul.f32 %v1784_v31, %v527_v38  ;;  %s603_s13 = sld [smem:[#allocation3 + %s602_s10]]  ;;  %s638_s10 = sadd.s32 38, %s1702_s12 }
  0x44   : >> { %v519_v42 = vmul.f32 %v1784_v31, %v518_v39  ;;  %s594_s11 = sld [smem:[#allocation3 + %s593_s7]]  ;;  %s656_s7 = sadd.s32 92, %s1702_s12 }
  0x45   : >> { %408 = vrot.lane.b32.xlu2 %v406_v21, %s2318_s29  ;;  %v536_v43 = vstv %s535_s27  ;;  %s620_s27 = sadd.s32 91, %s1702_s12  ;;  %v1867_v21 = vld [vmem:[%s1732_s14 + $0x1a] sm:$0xff]  ;;  %p280_p11 = scmp.ge.s32.totalorder %s283_s6, 2  }
  0x46   : >> { %v554_v44 = vstv %s553_s18  ;;  %v537_v46 = vmul.f32 %v1784_v31, %v536_v43  ;;  %s612_s18 = sld [smem:[#allocation3 + %s611_s15]]  ;;  %vm1243_vm1 = vcmask (%p280_p11), 523264   ;;  %vm1261_vm2 = vcmask (%p280_p11), 31744  }
  0x47   : >> { %426 = vrot.lane.b32.xlu1 %v424_v22, %s2318_s29  ;;  %v545_v45 = vstv %s544_s8  ;;  %v555_v47 = vmul.f32 %v1784_v31, %v554_v44  ;;  %s630_s8 = sld [smem:[#allocation3 + %s629_s23]]  ;;  %s688_s23 = sadd.s32 13, %s1702_s12 }
  0x48   : >> { %v546_v48 = vmul.f32 %v1784_v31, %v545_v45  ;;  %v563_v49 = vstv %s562_s9  ;;  %s621_s28 = sld [smem:[#allocation3 + %s620_s27]]  ;;  %s647_s9 = sadd.s32 65, %s1702_s12 }
  0x49   : >> { %417 = vrot.lane.b32.xlu0 %v415_v23, %s2318_s29  ;;  %v604_v51 = vstv %s603_s13  ;;  %v564_v53 = vmul.f32 %v1784_v31, %v563_v49  ;;  %s639_s13 = sld [smem:[#allocation3 + %s638_s10]]  ;;  %s706_s27 = sadd.s32 67, %s1702_s12 }
  0x4a   : >> { %v595_v52 = vstv %s594_s11  ;;  %v605_v54 = vmul.f32 %v1814_v50, %v604_v51  ;;  %s657_s11 = sld [smem:[#allocation3 + %s656_s7]]  ;;  %s715_s7 = sadd.s32 94, %s1702_s12 }
  0x4b   : >> { %v596_v55 = vmul.f32 %v1814_v50, %v595_v52  ;;  %s648_s15 = sld [smem:[#allocation3 + %s647_s9]]  ;;  %s733_s9 = sadd.s32 41, %s1702_s12 }
  0x4c   : >> { %v613_v56 = vstv %s612_s18  ;;  %s697_s18 = sadd.s32 40, %s1702_s12 }
  0x4d   : >> { %435 = vrot.lane.b32.xlu2 %v433_v27, %s2318_s29  ;;  %v631_v57 = vstv %s630_s8  ;;  %v614_v59 = vmul.f32 %v1814_v50, %v613_v56  ;;  %s689_s8 = sld [smem:[#allocation3 + %s688_s23]] }
  0x4e   : >> { %v622_v58 = vstv %s621_s28  ;;  %v632_v60 = vmul.f32 %v1814_v50, %v631_v57  ;;  %s707_s28 = sld [smem:[#allocation3 + %s706_s27]]  ;;  %s742_s27 = sadd.s32 68, %s1702_s12 }
  0x4f   : >> { %453 = vrot.lane.b32.xlu1 %v451_v28, %s2320_s17  ;;  %v623_v61 = vmul.f32 %v1814_v50, %v622_v58  ;;  %v640_v62 = vstv %s639_s13  ;;  %s698_s10 = sld [smem:[#allocation3 + %s697_s18]]  ;;  %s724_s13 = sadd.s32 14, %s1702_s12 }
  0x50   : >> { %v658_v63 = vstv %s657_s11  ;;  %v641_v2 = vmul.f32 %v1814_v50, %v640_v62  ;;  %s716_s11 = sld [smem:[#allocation3 + %s715_s7]]  ;;  %s783_s18 = sadd.s32 16, %s1702_s12 }
  0x51   : >> { %444 = vrot.lane.b32.xlu0 %v442_v29, %s2320_s17  ;;  %v649_v1 = vstv %s648_s15  ;;  %v659_v3 = vmul.f32 %v1814_v50, %v658_v63  ;;  %s734_s15 = sld [smem:[#allocation3 + %s733_s9]]  ;;  %s792_s9 = sadd.s32 43, %s1702_s12 }
  0x52   : >> { %v650_v4 = vmul.f32 %v1814_v50, %v649_v1  ;;  %s725_s23 = sld [smem:[#allocation3 + %s724_s13]]  ;;  %s810_s13 = sadd.s32 97, %s1702_s12 }
  0x53   : >> { %v690_v5 = vstv %s689_s8  ;;  %s751_s8 = sadd.s32 95, %s1702_s12 }
  0x54   : >> { %v708_v7 = vstv %s707_s28  ;;  %v691_v9 = vmul.f32 %v1844_v6, %v690_v5  ;;  %s743_s28 = sld [smem:[#allocation3 + %s742_s27]] }
  0x55   : >> { %462 = vrot.lane.b32.xlu2 %v460_v34, %s2320_s17  ;;  %v699_v8 = vstv %s698_s10  ;;  %v709_v10 = vmul.f32 %v1844_v6, %v708_v7  ;;  %s784_s10 = sld [smem:[#allocation3 + %s783_s18]]  ;;  %s819_s18 = sadd.s32 17, %s1702_s12 }
  0x56   : >> { %v700_v11 = vmul.f32 %v1844_v6, %v699_v8  ;;  %v717_v12 = vstv %s716_s11  ;;  %s752_s7 = sld [smem:[#allocation3 + %s751_s8]]  ;;  %s801_s11 = sadd.s32 70, %s1702_s12 }
  0x57   : >> { %503 = vrot.lane.b32.xlu1 %v501_v35, %s2318_s29  ;;  %v735_v13 = vstv %s734_s15  ;;  %v718_v15 = vmul.f32 %v1844_v6, %v717_v12  ;;  %s793_s15 = sld [smem:[#allocation3 + %s792_s9]] }
  0x58   : >> { %v726_v14 = vstv %s725_s23  ;;  %v736_v16 = vmul.f32 %v1844_v6, %v735_v13  ;;  %s811_s23 = sld [smem:[#allocation3 + %s810_s13]] }
  0x59   : >> { %471 = vrot.lane.b32.xlu0 %v469_v36, %s2320_s17  ;;  %v727_v17 = vmul.f32 %v1844_v6, %v726_v14  ;;  %s802_s27 = sld [smem:[#allocation3 + %s801_s11]] }
  0x5a   : >> { %v744_v19 = vstv %s743_s28  ;;  %s1875_s8 = sld [smem:[#allocation3 + %s1702_s12]]  ;;  %s837_s28 = sadd.s32 71, %s1702_s12 }
  0x5b   : >> { %v785_v22 = vstv %s784_s10  ;;  %v745_v24 = vmul.f32 %v1844_v6, %v744_v19  ;;  %s383_s10 = sadd.s32 3, %s1702_s12  ;;  %s1882_s9 = sld [smem:[#allocation3 + %s819_s18]] }
  0x5c   : >> { %v753_v23 = vstv %s752_s7  ;;  %v786_v25 = vmul.f32 %v1867_v21, %v785_v22  ;;  %s828_s7 = sadd.s32 44, %s1702_s12  ;;  %s1886_s13 = sld [smem:[#allocation3 + %s837_s28]] }
  0x5d   : >> { %512 = vrot.lane.b32.xlu2 %v510_v40, %s2318_s29  ;;  %v754_v26 = vmul.f32 %v1844_v6, %v753_v23  ;;  %v794_v27 = vstv %s793_s15  ;;  %s1889_s11 = sld [smem:[#allocation3 + %s383_s10]]  ;;  %s293_s15 = sadd.s32 27, %s1702_s12 }
  0x5e   : >> { %v812_v29 = vstv %s811_s23  ;;  %v795_v32 = vmul.f32 %v1867_v21, %v794_v27  ;;  %s846_s18 = sadd.s32 98, %s1702_s12  ;;  %s1899_s23 = sld [smem:[#allocation3 + %s293_s15]] }
  0x5f   : >> { %530 = vrot.lane.b32.xlu1 %v528_v41, %s2318_s29  ;;  %v803_v30 = vstv %s802_s27  ;;  %v813_v33 = vmul.f32 %v1867_v21, %v812_v29  ;;  %s887_s28 = sadd.s32 46, %s1702_s12  ;;  %s2328_s10 = smov 127  }
  0x60   : >> { %v804_v34 = vmul.f32 %v1867_v21, %v803_v30  ;;  %v290_v35 = vstv %s1875_s8  ;;  %s303_s27 = sadd.s32 81, %s1702_s12  ;;  %s1912_s8 = sld [smem:[#allocation3 + %s887_s28]] }
  0x61   : >> { %521 = vrot.lane.b32.xlu0 %v519_v42, %s2318_s29  ;;  %v821_v36 = vstv %s1882_s9  ;;  %v291_v37 = vmul.f32 %v290_v35, %v1735_v0  ;;  %s1918_s15 = sld [smem:[#allocation3 + %s303_s27]]  ;;  %s914_s28 = sadd.s32 20, %s1702_s12 }
  0x62   : >> { %v839_v39 = vstv %s1886_s13  ;;  %v822_v43 = vmul.f32 %v1867_v21, %v821_v36  ;;  %s1925_s13 = sld [smem:[#allocation3 + %s298_s0]]  ;;  %s2329_s0 = smov 126  }
  0x63   : >> { %v385_v41 = vstv %s1889_s11  ;;  %v840_v45 = vmul.f32 %v1867_v21, %v839_v39  ;;  %s896_s11 = sadd.s32 73, %s1702_s12  ;;  %s393_s27 = sadd.s32 57, %s1702_s12 }
  0x64   : >> { %v295_v49 = vstv %s1899_s23  ;;  %s1941_s1 = sld [smem:[#allocation3 + %s896_s11]] }
  0x65   : >> { %539 = vrot.lane.b32.xlu2 %v537_v46, %s2320_s17  ;;  %s1948_s23 = sld [smem:[#allocation3 + %s914_s28]] }
  0x66   : >> { %v889_v56 = vstv %s1912_s8 }
  0x67   : >> { %557 = vrot.lane.b32.xlu1 %v555_v47, %s2320_s17  ;;  %v386_v47 = vmul.f32 %v1763_v18, %v385_v41  ;;  %v305_v58 = vstv %s1918_s15  ;;  %s923_s15 = sadd.s32 47, %s1702_s12 }
  0x68   : >> { %v300_v63 = vstv %s1925_s13  ;;  %s932_s13 = sadd.s32 74, %s1702_s12  ;;  %s1976_s28 = sld [smem:[#allocation3 + %s923_s15]] }
  0x69   : >> { %548 = vrot.lane.b32.xlu0 %v546_v48, %s2320_s17  ;;  %v301_v8 = vmul.f32 %v300_v63, %v1735_v0 }
  0x6b   : >> { %v916_v13 = vstv %s1948_s23 }
  0x6d   : >> { %566 = vrot.lane.b32.xlu2 %v564_v53, %s2320_s17 }
  0x6f   : >> { %607 = vrot.lane.b32.xlu1 %v605_v54, %s2318_s29  ;;  %v296_v54 = vmul.f32 %v295_v49, %v1735_v0 }
  0x71   : >> { %598 = vrot.lane.b32.xlu0 %v596_v55, %s2318_s29  ;;  %v1945_v55 = vld [vmem:[%s1732_s14 + $0x30] sm:$0xff] }
  0x72   : >> { %v917_v23 = vmul.f32 %v1945_v55, %v916_v13 }
  0x75   : >> { %616 = vrot.lane.b32.xlu2 %v614_v59, %s2318_s29 }
  0x77   : >> { %634 = vrot.lane.b32.xlu1 %v632_v60, %s2320_s17 }
  0x79   : >> { %625 = vrot.lane.b32.xlu0 %v623_v61, %s2318_s29 }
  0x7d   : >> { %643 = vrot.lane.b32.xlu2 %v641_v2, %s2320_s17  ;;  %v890_v2 = vmul.f32 %v1945_v55, %v889_v56 }
  0x7f   : >> { %661 = vrot.lane.b32.xlu1 %v659_v3, %s2320_s17  ;;  %v306_v3 = vmul.f32 %v305_v58, %v1735_v0 }
  0x81   : >> { %652 = vrot.lane.b32.xlu0 %v650_v4, %s2320_s17 }
  0x85   : >> { %693 = vrot.lane.b32.xlu2 %v691_v9, %s2318_s29 }
  0x87   : >> { %711 = vrot.lane.b32.xlu1 %v709_v10, %s2318_s29  ;;  %v898_v10 = vstv %s1941_s1  ;;  %s1986_s1 = sld [smem:[#allocation3 + %s932_s13]] }
  0x89   : >> { %702 = vrot.lane.b32.xlu0 %v700_v11, %s2318_s29 }
  0x8d   : >> { %720 = vrot.lane.b32.xlu2 %v718_v15, %s2318_s29 }
  0x8f   : >> { %738 = vrot.lane.b32.xlu1 %v736_v16, %s2320_s17  ;;  %v1864_v20 = vpop.permute.xlu2 %349 }
  0x91   : >> { %729 = vrot.lane.b32.xlu0 %v727_v17, %s2320_s17 }
  0x95   : >> { %747 = vrot.lane.b32.xlu2 %v745_v24, %s2320_s17 }
  0x97   : >> { %788 = vrot.lane.b32.xlu1 %v786_v25, %s2318_s29  ;;  %v1884_v28 = vpop.permute.xlu2 %358  ;;  %s1891_s29 = sld [smem:[#allocation3 + %s828_s7]]  ;;  %s878_s7 = sadd.s32 19, %s1702_s12 }
  0x98   : >> { %s1921_s9 = sld [smem:[#allocation3 + %s878_s7]]  ;;  %s905_s7 = sadd.s32 100, %s1702_s12 }
  0x99   : >> { %756 = vrot.lane.b32.xlu0 %v754_v26, %s2320_s17  ;;  %s1907_s17 = sld [smem:[#allocation3 + %s846_s18]]  ;;  %s398_s18 = sadd.s32 84, %s1702_s12 }
  0x9a   : >> { %s1958_s11 = sld [smem:[#allocation3 + %s905_s7]]  ;;  %s973_s7 = sadd.s32 22, %s1702_s12 }
  0x9d   : >> { %797 = vrot.lane.b32.xlu2 %v795_v32, %s2328_s10  ;;  %v830_v42 = vstv %s1891_s29  ;;  %s1932_s29 = sld [smem:[#allocation3 + %s398_s18]]  ;;  %s388_s18 = sadd.s32 30, %s1702_s12  ;;  %v925_v32 = vstv %s1976_s28 }
  0x9e   : >> { %v831_v48 = vmul.f32 %v1867_v21, %v830_v42  ;;  %v880_v61 = vstv %s1921_s9  ;;  %s1963_s8 = sld [smem:[#allocation3 + %s388_s18]]  ;;  %s941_s9 = sadd.s32 101, %s1702_s12  ;;  %v926_v39 = vmul.f32 %v1945_v55, %v925_v32 }
  0x9f   : >> { %815 = vrot.lane.b32.xlu1 %v813_v33, %s2328_s10  ;;  %v409_v38 = vpop.permute.xlu2 %408  ;;  %v848_v52 = vstv %s1907_s17  ;;  %s1953_s17 = sld [smem:[#allocation3 + %s393_s27]]  ;;  %v881_v5 = vmul.f32 %v1945_v55, %v880_v61  ;;  %s483_s27 = sadd.s32 33, %s1702_s12 }
  0xa0   : >> { %v849_v62 = vmul.f32 %v1867_v21, %v848_v52  ;;  %v907_v19 = vstv %s1958_s11  ;;  %s1995_s23 = sld [smem:[#allocation3 + %s483_s27]]  ;;  %s991_s18 = sadd.s32 76, %s1702_s12 }
  0xa1   : >> { %806 = vrot.lane.b32.xlu0 %v804_v34, %s2328_s10  ;;  %v1915_v40 = vpop.permute.xlu1 %331  ;;  %s982_s11 = sadd.s32 49, %s1702_s12  ;;  %s2009_s15 = sld [smem:[#allocation3 + %s991_s18]] }
  0xa2   : >> { %v334_v16 = vadd.f32 %v1915_v40, %v301_v8  ;;  %s2015_s13 = sld [smem:[#allocation3 + %s982_s11]]  ;;  %s1000_s28 = sadd.s32 103, %s1702_s12 }
  0xa3   : >> { %v314_v44 = vpop.permute.xlu0 %313  ;;  %v400_v7 = vstv %s1932_s29  ;;  %s1980_s29 = sld [smem:[#allocation3 + %s941_s9]]  ;;  %s1009_s27 = sadd.s32 23, %s1702_s12 }
  0xa4   : >> { %v316_v46 = vadd.f32 %v314_v44, %v291_v37  ;;  %v401_v12 = vmul.f32 %v1763_v18, %v400_v7  ;;  %v390_v24 = vstv %s1963_s8  ;;  %s2006_s8 = sld [smem:[#allocation3 + %s973_s7]] }
  0xa5   : >> { %824 = vrot.lane.b32.xlu2 %v822_v43, %s2329_s0  ;;  %v395_v15 = vstv %s1953_s17  ;;  %v391_v30 = vmul.f32 %v1763_v18, %v390_v24  ;;  %s478_s17 = sadd.s32 6, %s1702_s12  ;;  %s2030_s7 = sld [smem:[#allocation3 + %s1000_s28]] }
  0xa6   : >> { %v352_v51 = vadd.f32 %v1864_v20, %v316_v46  ;;  %v899_v20 = vmul.f32 %v1945_v55, %v898_v10  ;;  %v396_v27 = vmul.f32 %v1763_v18, %v395_v15  ;;  %s2012_s9 = sld [smem:[#allocation3 + %s478_s17]] }
  0xa7   : >> { %842 = vrot.lane.b32.xlu1 %v840_v45, %s2329_s0  ;;  %v436_v57 = vpop.permute.xlu2 %435  ;;  %v485_v45 = vstv %s1995_s23  ;;  %v993_v49 = vstv %s2009_s15  ;;  %s488_s23 = sadd.s32 60, %s1702_s12  ;;  %s2045_s11 = sld [smem:[#allocation3 + %s1009_s27]] }
  0xa8   : >> { %v387_v53 = vadd.f32 %v386_v47, %v352_v51  ;;  %v486_v47 = vmul.f32 %v1784_v31, %v485_v45  ;;  %v984_v56 = vstv %s2015_s13  ;;  %s1027_s15 = sadd.s32 77, %s1702_s12  ;;  %s1036_s13 = sadd.s32 104, %s1702_s12 }
  0xa9   : >> { %833 = vrot.lane.b32.xlu0 %v831_v48, %s2329_s0  ;;  %v341_v59 = vpop.permute.xlu1 %340  ;;  %v943_v34 = vstv %s1980_s29  ;;  %s1018_s29 = sadd.s32 50, %s1702_s12  ;;  %v2034_v48 = vld [vmem:[%s1732_s14 + $0x31] sm:$0xff]  ;;  %s2062_s28 = sld [smem:[#allocation3 + %s1027_s15]] }
  0xaa   : >> { %v1955_v60 = vadd.f32 %v409_v38, %v387_v53  ;;  %v343_v11 = vadd.f32 %v341_v59, %v306_v3  ;;  %v934_v38 = vstv %s1986_s1  ;;  %v944_v41 = vmul.f32 %v1945_v55, %v943_v34  ;;  %s493_s1 = sadd.s32 87, %s1702_s12  ;;  %s2037_s18 = sld [smem:[#allocation3 + %s1018_s29]] }
  0xab   : >> { %v323_v1 = vpop.permute.xlu0 %322  ;;  %v935_v44 = vmul.f32 %v1945_v55, %v934_v38  ;;  %v975_v46 = vstv %s2006_s8  ;;  %s2042_s17 = sld [smem:[#allocation3 + %s493_s1]]  ;;  %v994_v59 = vmul.f32 %v2034_v48, %v993_v49  ;;  %v1002_v3 = vstv %s2030_s7  ;;  %s583_s27 = sadd.s32 63, %s1702_s12 }
  0xac   : >> { %v325_v4 = vadd.f32 %v323_v1, %v296_v54  ;;  %v480_v53 = vstv %s2012_s9  ;;  %s2049_s8 = sld [smem:[#allocation3 + %s488_s23]]  ;;  %v985_v1 = vmul.f32 %v2034_v48, %v984_v56  ;;  %s1068_s9 = sadd.s32 25, %s1702_s12 }
  0xad   : >> { %851 = vrot.lane.b32.xlu2 %v849_v62, %s2329_s0  ;;  %v481_v63 = vmul.f32 %v1784_v31, %v480_v53  ;;  %s2065_s29 = sld [smem:[#allocation3 + %s1068_s9]]  ;;  %v1011_v10 = vstv %s2045_s11  ;;  %s1077_s7 = sadd.s32 52, %s1702_s12 }
  0xae   : >> { %v361_v9 = vadd.f32 %v1884_v28, %v325_v4  ;;  %v908_v28 = vmul.f32 %v1945_v55, %v907_v19  ;;  %s2070_s1 = sld [smem:[#allocation3 + %s1036_s13]]  ;;  %s1095_s23 = sadd.s32 106, %s1702_s12 }
  0xaf   : >> { %892 = vrot.lane.b32.xlu1 %v890_v2, %s2328_s10  ;;  %v463_v14 = vpop.permute.xlu2 %462  ;;  %s1086_s11 = sadd.s32 79, %s1702_s12  ;;  %s2097_s15 = sld [smem:[#allocation3 + %s1095_s23]] }
  0xb0   : >> { %v392_v37 = vadd.f32 %v391_v30, %v361_v9  ;;  %v1020_v4 = vstv %s2037_s18  ;;  %s2082_s18 = sld [smem:[#allocation3 + %s583_s27]]  ;;  %s573_s9 = sadd.s32 9, %s1702_s12 }
  0xb1   : >> { %883 = vrot.lane.b32.xlu0 %v881_v5, %s2328_s10  ;;  %v377_v0 = vpop.permute.xlu1 %376  ;;  %v495_v8 = vstv %s2042_s17  ;;  %v1021_v13 = vmul.f32 %v2034_v48, %v1020_v4  ;;  %s578_s17 = sadd.s32 36, %s1702_s12  ;;  %s1113_s27 = sadd.s32 53, %s1702_s12 }
  0xb2   : >> { %v379_v17 = vadd.f32 %v377_v0, %v343_v11  ;;  %v1003_v11 = vmul.f32 %v2034_v48, %v1002_v3  ;;  %s2101_s13 = sld [smem:[#allocation3 + %s578_s17]]  ;;  %s588_s17 = sadd.s32 90, %s1702_s12 }
  0xb3   : >> { %v368_v22 = vpop.permute.xlu0 %367  ;;  %v1070_v24 = vstv %s2065_s29  ;;  %s1104_s29 = sadd.s32 26, %s1702_s12 }
  0xb4   : >> { %v370_v25 = vadd.f32 %v368_v22, %v334_v16  ;;  %v402_v26 = vadd.f32 %v401_v12, %v379_v17  ;;  %v496_v16 = vmul.f32 %v1784_v31, %v495_v8  ;;  %v1012_v17 = vmul.f32 %v2034_v48, %v1011_v10 }
  0xb5   : >> { %901 = vrot.lane.b32.xlu2 %v899_v20, %s2328_s10  ;;  %v1029_v20 = vstv %s2062_s28  ;;  %s2109_s28 = sld [smem:[#allocation3 + %s573_s9]]  ;;  %v1097_v38 = vstv %s2097_s15  ;;  %s1131_s15 = sadd.s32 107, %s1702_s12 }
  0xb6   : >> { %v1998_v29 = vadd.f32 %v436_v57, %v402_v26  ;;  %v397_v33 = vadd.f32 %v396_v27, %v370_v25  ;;  %v976_v57 = vmul.f32 %v2034_v48, %v975_v46 }
  0xb7   : >> { %919 = vrot.lane.b32.xlu1 %v917_v23, %s2329_s0  ;;  %v513_v35 = vpop.permute.xlu2 %512  ;;  %v2094_v23 = vld [vmem:[%s1732_s14 + $0x32] sm:$0xff]  ;;  %s2105_s14 = sld [smem:[#allocation3 + %s1086_s11]]  ;;  %s668_s11 = sadd.s32 12, %s1702_s12 }
  0xb8   : >> { %v1071_v32 = vmul.f32 %v2094_v23, %v1070_v24  ;;  %v1098_v46 = vmul.f32 %v2094_v23, %v1097_v38  ;;  %s2143_s9 = sld [smem:[#allocation3 + %s668_s11]]  ;;  %s858_s11 = sadd.s32 18, %s1702_s12 }
  0xb9   : >> { %910 = vrot.lane.b32.xlu0 %v908_v28, %s2328_s10  ;;  %v427_v18 = vpop.permute.xlu1 %426  ;;  %v1038_v28 = vstv %s2070_s1  ;;  %s1122_s1 = sadd.s32 80, %s1702_s12 }
  0xba   : >> { %v429_v36 = vadd.f32 %v427_v18, %v397_v33  ;;  %v585_v18 = vstv %s2082_s18  ;;  %s2125_s23 = sld [smem:[#allocation3 + %s1122_s1]] }
  0xbb   : >> { %v418_v40 = vpop.permute.xlu0 %417  ;;  %s2131_s18 = sld [smem:[#allocation3 + %s1113_s27]] }
  0xbc   : >> { %v420_v42 = vadd.f32 %v418_v40, %v392_v37  ;;  %v2019_v43 = vadd.f32 %v463_v14, %v429_v36  ;;  %v490_v14 = vstv %s2049_s8  ;;  %s2091_s8 = sld [smem:[#allocation3 + %s1077_s7]]  ;;  %v586_v37 = vmul.f32 %v1814_v50, %v585_v18 }
  0xbd   : >> { %928 = vrot.lane.b32.xlu2 %v926_v39, %s2329_s0  ;;  %v491_v19 = vmul.f32 %v1784_v31, %v490_v14  ;;  %s2121_s7 = sld [smem:[#allocation3 + %s1104_s29]]  ;;  %s673_s29 = sadd.s32 39, %s1702_s12 }
  0xbe   : >> { %v670_v10 = vstv %s2143_s9  ;;  %s674_s27 = sld [smem:[#allocation3 + %s673_s29]]  ;;  %s773_s9 = sadd.s32 69, %s1702_s12 }
  0xbf   : >> { %946 = vrot.lane.b32.xlu1 %v944_v41, %s2329_s0  ;;  %v540_v51 = vpop.permute.xlu2 %539  ;;  %v492_v27 = vadd.f32 %v491_v19, %v2019_v43  ;;  %v580_v41 = vstv %s2101_s13  ;;  %v1088_v43 = vstv %s2105_s14  ;;  %s2149_s13 = sld [smem:[#allocation3 + %s1131_s15]]  ;;  %s683_s14 = sadd.s32 93, %s1702_s12 }
  0xc0   : >> { %v1089_v53 = vmul.f32 %v2094_v23, %v1088_v43  ;;  %s859_s15 = sld [smem:[#allocation3 + %s858_s11]] }
  0xc1   : >> { %937 = vrot.lane.b32.xlu0 %v935_v44, %s2329_s0  ;;  %v454_v52 = vpop.permute.xlu1 %453 }
  0xc2   : >> { %v456_v54 = vadd.f32 %v454_v52, %v420_v42  ;;  %v1079_v36 = vstv %s2091_s8  ;;  %s2137_s8 = sld [smem:[#allocation3 + %s588_s17]]  ;;  %v581_v52 = vmul.f32 %v1814_v50, %v580_v41 }
  0xc3   : >> { %v445_v58 = vpop.permute.xlu0 %444  ;;  %v1080_v44 = vmul.f32 %v2094_v23, %v1079_v36 }
  0xc4   : >> { %v447_v61 = vadd.f32 %v445_v58, %v1955_v60  ;;  %v487_v62 = vadd.f32 %v486_v47, %v456_v54  ;;  %v575_v47 = vstv %s2109_s28  ;;  %s678_s28 = sadd.s32 66, %s1702_s12 }
  0xc5   : >> { %978 = vrot.lane.b32.xlu2 %v976_v57, %s2328_s10  ;;  %v576_v56 = vmul.f32 %v1814_v50, %v575_v47  ;;  %v1106_v57 = vstv %s2121_s7  ;;  %s679_s1 = sld [smem:[#allocation3 + %s678_s28]]  ;;  %s768_s7 = sadd.s32 42, %s1702_s12 }
  0xc6   : >> { %v2056_v2 = vadd.f32 %v513_v35, %v487_v62  ;;  %v482_v60 = vadd.f32 %v481_v63, %v447_v61  ;;  %v1039_v35 = vmul.f32 %v2034_v48, %v1038_v28  ;;  %v1107_v3 = vmul.f32 %v2094_v23, %v1106_v57 }
  0xc7   : >> { %996 = vrot.lane.b32.xlu1 %v994_v59, %s2328_s10  ;;  %v567_v5 = vpop.permute.xlu2 %566  ;;  %v1124_v59 = vstv %s2125_s23  ;;  %s769_s23 = sld [smem:[#allocation3 + %s768_s7]] }
  0xc8   : >> { %v1125_v4 = vmul.f32 %v2094_v23, %v1124_v59 }
  0xc9   : >> { %987 = vrot.lane.b32.xlu0 %v985_v1, %s2328_s10  ;;  %v504_v7 = vpop.permute.xlu1 %503 }
  0xca   : >> { %v506_v9 = vadd.f32 %v504_v7, %v482_v60 }
  0xcb   : >> { %v472_v12 = vpop.permute.xlu0 %471 }
  0xcc   : >> { %v474_v0 = vadd.f32 %v472_v12, %v1998_v29  ;;  %v2077_v15 = vadd.f32 %v540_v51, %v506_v9  ;;  %v1030_v29 = vmul.f32 %v2034_v48, %v1029_v20  ;;  %v1133_v12 = vstv %s2149_s13  ;;  %s774_s13 = sld [smem:[#allocation3 + %s773_s9]] }
  0xcd   : >> { %1005 = vrot.lane.b32.xlu2 %v1003_v11, %s2328_s10 }
  0xce   : >> { %v497_v22 = vadd.f32 %v496_v16, %v474_v0  ;;  %v577_v1 = vadd.f32 %v576_v56, %v2077_v15 }
  0xcf   : >> { %1023 = vrot.lane.b32.xlu1 %v1021_v13, %s2329_s0  ;;  %v617_v25 = vpop.permute.xlu2 %616  ;;  %v671_v13 = vmul.f32 %v1844_v6, %v670_v10 }
  0xd1   : >> { %1014 = vrot.lane.b32.xlu0 %v1012_v17, %s2329_s0  ;;  %v531_v31 = vpop.permute.xlu1 %530 }
  0xd2   : >> { %v533_v26 = vadd.f32 %v531_v31, %v497_v22 }
  0xd3   : >> { %v522_v30 = vpop.permute.xlu0 %521 }
  0xd4   : >> { %v524_v33 = vadd.f32 %v522_v30, %v492_v27  ;;  %v2111_v34 = vadd.f32 %v567_v5, %v533_v26  ;;  %v590_v5 = vstv %s2137_s8  ;;  %v680_v27 = vstv %s679_s1  ;;  %s868_s1 = sadd.s32 72, %s1702_s12 }
  0xd5   : >> { %1032 = vrot.lane.b32.xlu2 %v1030_v29, %s2329_s0  ;;  %v591_v11 = vmul.f32 %v1814_v50, %v590_v5  ;;  %v1134_v50 = vmul.f32 %v2094_v23, %v1133_v12  ;;  %v675_v30 = vstv %s674_s27  ;;  %s863_s27 = sadd.s32 45, %s1702_s12  ;;  %s869_s7 = sld [smem:[#allocation3 + %s868_s1]] }
  0xd6   : >> { %v676_v18 = vmul.f32 %v1844_v6, %v675_v30  ;;  %s1053_s1 = sadd.s32 51, %s1702_s12 }
  0xd7   : >> { %1073 = vrot.lane.b32.xlu1 %v1071_v32, %s2328_s10  ;;  %v644_v39 = vpop.permute.xlu2 %643  ;;  %v592_v16 = vadd.f32 %v591_v11, %v2111_v34  ;;  %v681_v34 = vmul.f32 %v1844_v6, %v680_v27 }
  0xd9   : >> { %1041 = vrot.lane.b32.xlu0 %v1039_v35, %s2329_s0  ;;  %v558_v40 = vpop.permute.xlu1 %557 }
  0xda   : >> { %v560_v42 = vadd.f32 %v558_v40, %v524_v33 }
  0xdb   : >> { %v549_v45 = vpop.permute.xlu0 %548 }
  0xdc   : >> { %v551_v49 = vadd.f32 %v549_v45, %v2056_v2  ;;  %v587_v51 = vadd.f32 %v586_v37, %v560_v42  ;;  %v1115_v2 = vstv %s2131_s18  ;;  %s778_s18 = sadd.s32 96, %s1702_s12 }
  0xdd   : >> { %1082 = vrot.lane.b32.xlu2 %v1080_v44, %s2328_s10  ;;  %v1116_v9 = vmul.f32 %v2094_v23, %v1115_v2  ;;  %v770_v44 = vstv %s769_s23  ;;  %s779_s8 = sld [smem:[#allocation3 + %s778_s18]]  ;;  %s968_s23 = sadd.s32 102, %s1702_s12 }
  0xde   : >> { %v619_v54 = vadd.f32 %v617_v25, %v587_v51  ;;  %v582_v58 = vadd.f32 %v581_v52, %v551_v49  ;;  %v771_v45 = vmul.f32 %v1867_v21, %v770_v44  ;;  %s2213_s18 = sld [smem:[#allocation3 + %s968_s23]]  ;;  %s1163_s23 = sadd.s32 3, %s1706_s16 }
  0xdf   : >> { %1100 = vrot.lane.b32.xlu1 %v1098_v46, %s2328_s10  ;;  %v694_v61 = vpop.permute.xlu2 %693 }
  0xe1   : >> { %1091 = vrot.lane.b32.xlu0 %v1089_v53, %s2328_s10  ;;  %v608_v62 = vpop.permute.xlu1 %607  ;;  %s684_s10 = sld [smem:[#allocation3 + %s683_s14]]  ;;  %s873_s14 = sadd.s32 99, %s1702_s12 }
  0xe2   : >> { %v610_v63 = vadd.f32 %v608_v62, %v582_v58  ;;  %s874_s28 = sld [smem:[#allocation3 + %s873_s14]] }
  0xe3   : >> { %v599_v60 = vpop.permute.xlu0 %598  ;;  %v780_v11 = vstv %s779_s8  ;;  %s963_s8 = sadd.s32 75, %s1702_s12 }
  0xe4   : >> { %v601_v7 = vadd.f32 %v599_v60, %v577_v1  ;;  %v646_v8 = vadd.f32 %v644_v39, %v610_v63  ;;  %s2225_s9 = sld [smem:[#allocation3 + %s963_s8]]  ;;  %s1144_s8 = scalar_lea.vmem [#allocation2], %s2345_s19 }
  0xe5   : >> { %1109 = vrot.lane.b32.xlu2 %v1107_v3, %s2329_s0 }
  0xe6   : >> { %v677_v40 = vadd.f32 %v676_v18, %v646_v8 }
  0xe7   : >> { %1127 = vrot.lane.b32.xlu1 %v1125_v4, %s2329_s0  ;;  %v721_v14 = vpop.permute.xlu2 %720  ;;  %v685_v22 = vstv %s684_s10  ;;  %s953_s10 = sadd.s32 21, %s1702_s12 }
  0xe8   : >> { %v686_v25 = vmul.f32 %v1844_v6, %v685_v22  ;;  %s954_s29 = sld [smem:[#allocation3 + %s953_s10]] }
  0xe9   : >> { %1118 = vrot.lane.b32.xlu0 %v1116_v9, %s2329_s0  ;;  %v635_v0 = vpop.permute.xlu1 %634 }
  0xea   : >> { %v637_v15 = vadd.f32 %v635_v0, %v601_v7  ;;  %v781_v0 = vmul.f32 %v1867_v21, %v780_v11 }
  0xeb   : >> { %v626_v17 = vpop.permute.xlu0 %625 }
  0xec   : >> { %v628_v19 = vadd.f32 %v626_v17, %v592_v16  ;;  %v672_v20 = vadd.f32 %v671_v13, %v637_v15  ;;  %v860_v13 = vstv %s859_s15  ;;  %v775_v17 = vstv %s774_s13  ;;  %s958_s15 = sadd.s32 48, %s1702_s12  ;;  %s1063_s13 = sadd.s32 105, %s1702_s12 }
  0xed   : >> { %1136 = vrot.lane.b32.xlu2 %v1134_v50, %s2329_s0  ;;  %s763_s0 = sadd.s32 15, %s1702_s12  ;;  %v861_v50 = vmul.f32 %v1945_v55, %v860_v13  ;;  %s2233_s14 = sld [smem:[#allocation3 + %s958_s15]] }
  0xee   : >> { %v696_v24 = vadd.f32 %v694_v61, %v672_v20  ;;  %s764_s17 = sld [smem:[#allocation3 + %s763_s0]]  ;;  %v955_v27 = vstv %s954_s29  ;;  %s1058_s29 = sadd.s32 78, %s1702_s12 }
  0xef   : >> { %v748_v31 = vpop.permute.xlu2 %747  ;;  %s2209_s0 = sld [smem:[#allocation3 + %s863_s27]] }
  0xf0   : >> { %s2239_s10 = sld [smem:[#allocation3 + %s1063_s13]] }
  0xf1   : >> { %v662_v26 = vpop.permute.xlu1 %661  ;;  %s2252_s27 = sld [smem:[#allocation3 + %s1058_s29]] }
  0xf2   : >> { %v664_v28 = vadd.f32 %v662_v26, %v628_v19  ;;  %v875_v26 = vstv %s874_s28  ;;  %s2244_s28 = sld [smem:[#allocation5 + %s1706_s16]] }
  0xf3   : >> { %v653_v29 = vpop.permute.xlu0 %652 }
  0xf4   : >> { %v655_v32 = vadd.f32 %v653_v29, %v619_v54  ;;  %v687_v33 = vadd.f32 %v686_v25, %v664_v28  ;;  %v765_v60 = vstv %s764_s17  ;;  %v776_v25 = vmul.f32 %v1867_v21, %v775_v17  ;;  %s1048_s17 = sadd.s32 24, %s1702_s12 }
  0xf5   : >> { %v766_v5 = vmul.f32 %v1867_v21, %v765_v60  ;;  %v876_v29 = vmul.f32 %v1945_v55, %v875_v26  ;;  %s2218_s11 = sld [smem:[#allocation3 + %s1048_s17]]  ;;  %s1155_s17 = sadd.s32 2, %s1706_s16 }
  0xf6   : >> { %v723_v35 = vadd.f32 %v721_v14, %v687_v33  ;;  %v682_v36 = vadd.f32 %v681_v34, %v655_v32  ;;  %v956_v34 = vmul.f32 %v2034_v48, %v955_v27 }
  0xf7   : >> { %v798_v37 = vpop.permute.xlu2 %797 }
  0xf9   : >> { %v712_v38 = vpop.permute.xlu1 %711 }
  0xfa   : >> { %v714_v39 = vadd.f32 %v712_v38, %v682_v36 }
  0xfb   : >> { %v703_v41 = vpop.permute.xlu0 %702 }
  0xfc   : >> { %v705_v42 = vadd.f32 %v703_v41, %v677_v40  ;;  %v2176_v43 = vadd.f32 %v748_v31, %v714_v39 }
  0xfe   : >> { %v777_v32 = vadd.f32 %v776_v25, %v2176_v43  ;;  %v970_v43 = vstv %s2213_s18  ;;  %s1147_s18 = sadd.s32 1, %s1706_s16 }
  0xff   : >> { %v825_v46 = vpop.permute.xlu2 %824  ;;  %s1148_s15 = sld [smem:[#allocation5 + %s1147_s18]] }
 0x101   : >> { %v739_v47 = vpop.permute.xlu1 %738 }
 0x102   : >> { %v741_v49 = vadd.f32 %v739_v47, %v705_v42 }
 0x103   : >> { %v730_v51 = vpop.permute.xlu0 %729 }
 0x104   : >> { %v772_v52 = vadd.f32 %v771_v45, %v741_v49  ;;  %v732_v4 = vadd.f32 %v730_v51, %v696_v24  ;;  %v1050_v49 = vstv %s2218_s11  ;;  %s1156_s11 = sld [smem:[#allocation5 + %s1155_s17]] }
 0x106   : >> { %v2179_v6 = vadd.f32 %v798_v37, %v772_v52  ;;  %v767_v10 = vadd.f32 %v766_v5, %v732_v4  ;;  %v865_v37 = vstv %s2209_s0  ;;  %s2264_s0 = sld [smem:[#allocation5 + %s1163_s23]] }
 0x107   : >> { %v852_v53 = vpop.permute.xlu2 %851  ;;  %v866_v45 = vmul.f32 %v1945_v55, %v865_v37 }
 0x109   : >> { %v789_v54 = vpop.permute.xlu1 %788 }
 0x10a   : >> { %v791_v12 = vadd.f32 %v789_v54, %v767_v10  ;;  %v971_v54 = vmul.f32 %v2034_v48, %v970_v43  ;;  %v1065_v10 = vstv %s2239_s10 }
 0x10b   : >> { %v757_v56 = vpop.permute.xlu0 %756 }
 0x10c   : >> { %v759_v14 = vadd.f32 %v757_v56, %v723_v35  ;;  %v827_v16 = vadd.f32 %v825_v46, %v791_v12  ;;  %v870_v35 = vstv %s869_s7  ;;  %s2255_s7 = sld [smem:[#allocation3 + %s1053_s1]] }
 0x10d   : >> { %v871_v40 = vmul.f32 %v1945_v55, %v870_v35 }
 0x10e   : >> { %v782_v22 = vadd.f32 %v781_v0, %v759_v14  ;;  %v862_v31 = vadd.f32 %v861_v50, %v827_v16  ;;  %v1141_v14 = vstv %s2244_s28  ;;  %v1066_v50 = vmul.f32 %v2094_v23, %v1065_v10 }
 0x10f   : >> { %v2181_v57 = vpop.permute.xlu2 %901 }
 0x111   : >> { %v816_v58 = vpop.permute.xlu1 %815 }
 0x112   : >> { %v818_v24 = vadd.f32 %v816_v58, %v782_v22  ;;  %v1051_v58 = vmul.f32 %v2094_v23, %v1050_v49  ;;  %v1060_v22 = vstv %s2252_s27 }
 0x113   : >> { %v807_v59 = vpop.permute.xlu0 %806  ;;  %v1061_v26 = vmul.f32 %v2094_v23, %v1060_v22 }
 0x114   : >> { %v854_v33 = vadd.f32 %v852_v53, %v818_v24  ;;  %v809_v36 = vadd.f32 %v807_v59, %v777_v32  ;;  %v965_v59 = vstv %s2225_s9 }
 0x115   : >> { %v966_v5 = vmul.f32 %v2034_v48, %v965_v59 }
 0x116   : >> { %v877_v41 = vadd.f32 %v876_v29, %v854_v33 }
 0x117   : >> { %v2183_v61 = vpop.permute.xlu2 %928 }
 0x119   : >> { %v2185_v62 = vpop.permute.xlu1 %842 }
 0x11a   : >> { %v845_v39 = vadd.f32 %v2185_v62, %v809_v36 }
 0x11b   : >> { %v2188_v63 = vpop.permute.xlu0 %833 }
 0x11c   : >> { %v836_v44 = vadd.f32 %v2188_v63, %v2179_v6  ;;  %v872_v51 = vadd.f32 %v871_v40, %v845_v39  ;;  %v1157_v40 = vstv %s1156_s11 }
 0x11e   : >> { %v867_v6 = vadd.f32 %v866_v45, %v836_v44  ;;  %v904_v62 = vadd.f32 %v2181_v57, %v872_v51 }
 0x11f   : >> { %v2190_v1 = vpop.permute.xlu2 %978 }
 0x121   : >> { %v2192_v2 = vpop.permute.xlu1 %892 }
 0x122   : >> { %v895_v63 = vadd.f32 %v2192_v2, %v867_v6 }
 0x123   : >> { %v884_v3 = vpop.permute.xlu0 %883 }
 0x124   : >> { %v886_v28 = vadd.f32 %v884_v3, %v862_v31  ;;  %v960_v3 = vstv %s2233_s14  ;;  %v931_v57 = vadd.f32 %v2183_v61, %v895_v63 }
 0x125   : >> { %v961_v11 = vmul.f32 %v2034_v48, %v960_v3 }
 0x127   : >> { %v2198_v8 = vpop.permute.xlu2 %1005 }
 0x129   : >> { %v920_v7 = vpop.permute.xlu1 %919 }
 0x12a   : >> { %v922_v21 = vadd.f32 %v920_v7, %v886_v28 }
 0x12b   : >> { %v911_v9 = vpop.permute.xlu0 %910 }
 0x12c   : >> { %v957_v42 = vadd.f32 %v956_v34, %v922_v21  ;;  %v913_v46 = vadd.f32 %v911_v9, %v877_v41  ;;  %v1165_v21 = vstv %s2264_s0 }
 0x12e   : >> { %v981_v52 = vadd.f32 %v2190_v1, %v957_v42  ;;  %v1149_v42 = vstv %s1148_s15 }
 0x12f   : >> { %v2206_v20 = vpop.permute.xlu2 %1032 }
 0x131   : >> { %v947_v15 = vpop.permute.xlu1 %946 }
 0x132   : >> { %v949_v53 = vadd.f32 %v947_v15, %v913_v46 }
 0x133   : >> { %v938_v19 = vpop.permute.xlu0 %937 }
 0x134   : >> { %v972_v1 = vadd.f32 %v971_v54, %v949_v53  ;;  %v940_v4 = vadd.f32 %v938_v19, %v904_v62  ;;  %v962_v19 = vadd.f32 %v961_v11, %v931_v57 }
 0x136   : >> { %v1008_v2 = vadd.f32 %v2198_v8, %v972_v1  ;;  %v967_v0 = vadd.f32 %v966_v5, %v940_v4  ;;  %v1055_v8 = vstv %s2255_s7 }
 0x137   : >> { %v2227_v38 = vpop.permute.xlu2 %1082 }
 0x139   : >> { %v2216_v30 = vpop.permute.xlu1 %996 }
 0x13a   : >> { %v999_v17 = vadd.f32 %v2216_v30, %v967_v0  ;;  %v1056_v30 = vmul.f32 %v2094_v23, %v1055_v8 }
 0x13b   : >> { %v988_v18 = vpop.permute.xlu0 %987 }
 0x13c   : >> { %v990_v48 = vadd.f32 %v988_v18, %v962_v19  ;;  %v1035_v28 = vadd.f32 %v2206_v20, %v999_v17 }
 0x13e   : >> { %v1062_v18 = vadd.f32 %v1061_v26, %v1035_v28 }
 0x13f   : >> { %v1110_v60 = vpop.permute.xlu2 %1109 }
 0x141   : >> { %v1024_v47 = vpop.permute.xlu1 %1023 }
 0x142   : >> { %v1026_v29 = vadd.f32 %v1024_v47, %v990_v48 }
 0x143   : >> { %v1015_v56 = vpop.permute.xlu0 %1014 }
 0x144   : >> { %v1017_v55 = vadd.f32 %v1015_v56, %v981_v52  ;;  %v1057_v35 = vadd.f32 %v1056_v30, %v1026_v29 }
 0x146   : >> { %v1052_v7 = vadd.f32 %v1051_v58, %v1017_v55  ;;  %v1085_v20 = vadd.f32 %v2227_v38, %v1057_v35  ;;  %v1440_v38 = vld [vmem:[%s2315_s3] sm:$0xff] (%p280_p11) }
 0x147   : >> { %v1137_v27 = vpop.permute.xlu2 %1136  ;;  %1442 = vmatpush.bf16.msra.mxu2 (%p280_p11), %v1440_v38  ;;  %1443 = vmatpush.bf16.msra.mxu3 (%p280_p11), %v1440_v38 }
 0x148   : > { %1210 = vmatpush.bf16.msra.mxu0 (%p280_p11), %v1440_v38 }
 0x149   : >> { %v1074_v9 = vpop.permute.xlu1 %1073 }
 0x14a   : >> { %v1076_v12 = vadd.f32 %v1074_v9, %v1052_v7 }
 0x14b   : >> { %v1042_v13 = vpop.permute.xlu0 %1041 }
 0x14c   : >> { %v1044_v15 = vadd.f32 %v1042_v13, %v1008_v2  ;;  %v1112_v16 = vadd.f32 %v1110_v60, %v1076_v12 }
 0x14e   : >> { %v1142_v61 = vadd.f32 %v1141_v14, %v1112_v16  ;;  %v1067_v25 = vadd.f32 %v1066_v50, %v1044_v15  ;;  %v1441_v14 = vld [vmem:[%s2316_s4] sm:$0xff] (%p280_p11) }
 0x150   : >> { %v1143_v24 = vmax.f32 %v1142_v61, 0.0 }
 0x151   : >> { %v1101_v31 = vpop.permute.xlu1 %1100 }
 0x152   : >> { %1146 = vst.msk [vmem:[%s1144_s8] sm:$0xff] %vm1145_vm0, %v1143_v24  ;;  %v1103_v32 = vadd.f32 %v1101_v31, %v1067_v25 }
 0x153   : >> { %v1092_v33 = vpop.permute.xlu0 %1091 }
 0x154   : >> { %v1139_v34 = vadd.f32 %v1137_v27, %v1103_v32  ;;  %v1094_v37 = vadd.f32 %v1092_v33, %v1062_v18 }
 0x156   : >> { %v1166_v36 = vadd.f32 %v1165_v21, %v1139_v34 }
 0x158   : >> { %v1167_v39 = vmax.f32 %v1166_v36, 0.0 }
 0x159   : >> { %v1128_v41 = vpop.permute.xlu1 %1127 }
 0x15a   : >> { %1424 = vst.msk [vmem:[%s1144_s8 + $0x30] sm:$0xff] %vm1145_vm0, %v1167_v39  ;;  %v1130_v23 = vadd.f32 %v1128_v41, %v1094_v37 }
 0x15b   : >> { %v1119_v43 = vpop.permute.xlu0 %1118 }
 0x15c   : >> { %v1158_v44 = vadd.f32 %v1157_v40, %v1130_v23  ;;  %v1121_v45 = vadd.f32 %v1119_v43, %v1085_v20 }
 0x15e   : >> { %v1159_v46 = vmax.f32 %v1158_v44, 0.0  ;;  %v1150_v47 = vadd.f32 %v1149_v42, %v1121_v45  ;;  %282 = sbr.rel (!%p280_p11) target bundleno = 37 (0x25), region = 99 }
 0x160   : >> { %1423 = vst.msk [vmem:[%s1144_s8 + $0x20] sm:$0xff] %vm1145_vm0, %v1159_v46  ;;  %v1151_v49 = vmax.f32 %v1150_v47, 0.0 }
 0x162   : >> { %1422 = vst.msk [vmem:[%s1144_s8 + $0x10] sm:$0xff] %vm1145_vm0, %v1151_v49 }
 0x169   : > { %v1172_v51 = vld [vmem:[#allocation2 + $0x10] sm:$0xff]  ;;  %v1173_v52 = vld [vmem:[#allocation2 + $0x18] sm:$0xff]  ;;  %v1170_v55 = vld [vmem:[#allocation2] sm:$0xff] }
 0x16a   : > { %v1179_v53 = vpack.c.bf16 %v1173_v52, %v1172_v51  ;;  %v1176_v54 = vld [vmem:[#allocation2 + $0x30] sm:$0xff]  ;;  %v1177_v56 = vld [vmem:[#allocation2 + $0x38] sm:$0xff]  ;;  %v1171_v58 = vld [vmem:[#allocation2 + $0x8] sm:$0xff] }
 0x16b   : > { %v1181_v6 = vpack.c.bf16 %v1177_v56, %v1176_v54  ;;  %v1178_v59 = vpack.c.bf16 %v1171_v58, %v1170_v55  ;;  %v1174_v62 = vld [vmem:[#allocation2 + $0x20] sm:$0xff]  ;;  %v1175_v63 = vld [vmem:[#allocation2 + $0x28] sm:$0xff] }
 0x16c   : > { %1430 = vmatmul.msk.bf16.vlgmr.msra.gmra.mxu2 %vm1145_vm0, %v1179_v53  ;;  %v1180_v1 = vpack.c.bf16 %v1175_v63, %v1174_v62 }
 0x16d   : > { %1432 = vmatmul.msk.bf16.vlgmr.msra.gmra.mxu3 %vm1145_vm0, %v1181_v6  ;;  %1429 = vmatmul.msk.bf16.vlgmr.msra.gmra.mxu0 %vm1145_vm0, %v1178_v59 }
 0x17c   : > { %1431 = vmatmul.msk.bf16.gmra.mxu2 %vm1145_vm0, %v1180_v1 }
 0x1ea   : > { %v1212_v10 = vpop.f32.mrf.mxu0 }
 0x1ef   : > { %v1217_v3 = vpop.f32.mrf.mxu2 }
 0x1f0   : > { %v1227_v60 = vpop.f32.mrf.mxu3 }
 0x1f2   : > { %v1214_v12 = vpop.f32.mrf.mxu0 }
 0x1f3   : > { %v1234_v13 = vpack.c.bf16 %v1214_v12, %v1212_v10 }
 0x1f7   : > { %v1219_v4 = vpop.f32.mrf.mxu2 }
 0x1f8   : > { %v1229_v5 = vpop.f32.mrf.mxu3  ;;  %v1235_v11 = vpack.c.bf16 %v1219_v4, %v1217_v3 }
 0x1f9   : > { %v1237_v7 = vpack.c.bf16 %v1229_v5, %v1227_v60 }
 0x1fb   : > { %1251 = vmatpush.bf16.msra.mxu1 %v1237_v7 }
 0x1ff   : > { %v1222_v9 = vpop.f32.mrf.mxu2 }
 0x207   : > { %v1224_v57 = vpop.f32.mrf.mxu2 }
 0x208   : > { %v1236_v2 = vpack.c.bf16 %v1224_v57, %v1222_v9 }
 0x20a   : > { %1252 = vmatpush.bf16.msra.mxu1 %v1236_v2 }
 0x20e   : > { %1253 = vmatpush.bf16.msra.mxu1 %v1235_v11 }
 0x212   : > { %1254 = vmatpush.bf16.msra.mxu1 %v1234_v13 }
 0x215   : > { %1437 = vmatmul.msk.bf16.vlgmr.msra.gmra.mxu1 %vm1243_vm1, %v1441_v14 }
 0x292   : > { %v1256_v0 = vpop.f32.mrf.mxu1 }
 0x293   : > { %1262 = vst.msk [vmem:[%s1716_s30] sm:$0xff] %vm1261_vm2, %v1256_v0 }
 0x29a   : > { %v1258_v15 = vpop.f32.mrf.mxu1 }
 0x29b   : > { %1263 = vst.msk [vmem:[%s1716_s30 + $0x8] sm:$0xff] %vm1261_vm2, %v1258_v15 }
 0x29c PF: > { %s17_s22 = sadd.s32 1, %s1596_s22   ;;  %s2330_s18 = smov %s1588_s20 }
 0x29d   : > { %p14_p12 = scmp.ge.s32.totalorder %s17_s22, 10   ;;  %s2331_s19 = smov %s1592_s21 }
 0x29e   : > { %s2332_s20 = smov %s2335_s24  ;;  %s2333_s21 = smov %s2339_s25 }
 0x29f   :  { %16 = sbr.rel (!%p14_p12) target bundleno = 7 (0x7), region = 110 }
 0x2a4   :  { %1294 = vsyncpa [#allocation4], 1 }
 0x2a5   :  { %1296 = vsyncpa [#allocation4 + $0x1], 1 }
 0x2a6   :  { %1297 = vsyncpa [#allocation6], 1 }

</bundles_post_ra>
